<compile_context>
chip_gen: v7x
topology: tpu7x:2x2x1
jax: 0.10.0
libtpu: 0.0.40
codegen_flags: <defaults>
</compile_context>

<pallas_src>
import functools
import math

import jax
import jax.numpy as jnp
from jax.experimental import pallas as pl
from jax.experimental.pallas import tpu as pltpu

# ---- problem sizes (small, consistent with the module) ----
B = 2        # batch
S = 8        # decoder sequence length
S_ENC = 8    # encoder sequence length
D = 32       # d_model
H = 4        # heads
DK = D // H  # head dim
F = 64       # d_ff
EPS = 1e-6
NEG_INF = -1000000000.0


# -------------------- in-kernel helpers --------------------
def _layernorm(x):
    # (x - mu) / sqrt(std^2 + eps), torch.std is unbiased (ddof=1), no affine.
    mu = jnp.mean(x, axis=-1, keepdims=True)
    var = jnp.sum((x - mu) ** 2, axis=-1, keepdims=True) * (1.0 / (x.shape[-1] - 1))
    return (x - mu) * jax.lax.rsqrt(var + EPS)


def _mha_core(q, k, v, mask_ref, wo_ref, nb, sq, sk):
    """Multi-head attention core on flattened rows.

    q: (nb*sq, D), k/v: (nb*sk, D), mask_ref: (nb, sq, sk) ref,
    wo_ref: (H, DK, D) ref (w_o pre-split per head on the host).
    Accumulates per-head contributions through w_o instead of concatenating
    head outputs on the lane axis.  Bias of w_o is added by the caller.
    """
    inv_scale = 1.0 / math.sqrt(DK)
    outs = []
    for b in range(nb):                      # static, nb <= 2 (sublane slices)
        qb = q[b * sq:(b + 1) * sq, :]
        kb = k[b * sk:(b + 1) * sk, :]
        vb = v[b * sk:(b + 1) * sk, :]
        mask_zero = mask_ref[b] == 0.0       # compare done once per batch
        acc = jnp.zeros((sq, D), jnp.float32)
        for h in range(H):                   # static unroll over heads
            lo = h * DK
            qh = qb[:, lo:lo + DK]
            kh = kb[:, lo:lo + DK]
            vh = vb[:, lo:lo + DK]
            s = jnp.dot(qh, kh.T, preferred_element_type=jnp.float32) * inv_scale
            s = jnp.where(mask_zero, NEG_INF, s)     # masked_fill semantics
            m = jnp.max(s, axis=-1, keepdims=True)
            e = jnp.exp(s - m)
            p = e * pl.reciprocal(jnp.sum(e, axis=-1, keepdims=True))
            oh = jnp.dot(p, vh, preferred_element_type=jnp.float32)     # (sq, DK)
            acc = acc + jnp.dot(oh, wo_ref[h],
                                preferred_element_type=jnp.float32)     # (sq, D)
        outs.append(acc)
    return outs[0] if nb == 1 else jnp.concatenate(outs, axis=0)


# -------------------- Pallas kernel --------------------
def decoder_block_kernel(dec_ref, enc_ref, tmask_ref, smask_ref,
                         wqkv_s_ref, bqkv_s_ref, wo_s_ref, bo_s_ref,
                         wq_c_ref, bq_c_ref, wkv_c_ref, bkv_c_ref,
                         wo_c_ref, bo_c_ref,
                         w1_ref, b1_ref, w2_ref, b2_ref,
                         out_ref, *, nb):
    n = nb * S
    x_in = dec_ref[...].reshape(n, D)                    # flatten batch rows
    enc = enc_ref[...].reshape(nb * S_ENC, D)

    # --- self attention sublayer ---
    xn = _layernorm(x_in)
    qkv = (jnp.dot(xn, wqkv_s_ref[...], preferred_element_type=jnp.float32)
           + bqkv_s_ref[...])                            # (n, 3D) fused QKV
    sa = _mha_core(qkv[:, 0:D], qkv[:, D:2 * D], qkv[:, 2 * D:3 * D],
                   tmask_ref, wo_s_ref, nb, S, S) + bo_s_ref[...]
    x = sa + x_in

    # --- cross attention sublayer ---
    xn = _layernorm(x)
    qc = (jnp.dot(xn, wq_c_ref[...], preferred_element_type=jnp.float32)
          + bq_c_ref[...])                               # (n, D)
    kv = (jnp.dot(enc, wkv_c_ref[...], preferred_element_type=jnp.float32)
          + bkv_c_ref[...])                              # (nb*S_ENC, 2D) fused KV
    ca = _mha_core(qc, kv[:, 0:D], kv[:, D:2 * D],
                   smask_ref, wo_c_ref, nb, S, S_ENC) + bo_c_ref[...]
    x = x + ca

    # --- feed forward sublayer (no pre-norm in the original code) ---
    h1 = jnp.maximum(
        jnp.dot(x, w1_ref[...], preferred_element_type=jnp.float32) + b1_ref[...],
        0.0)
    ff = jnp.dot(h1, w2_ref[...], preferred_element_type=jnp.float32) + b2_ref[...]

    out_ref[...] = (ff + x).reshape(nb, S, D).astype(out_ref.dtype)


# -------------------- host-side wrapper --------------------
def _use_batch_grid():
    # v7x has 2 TensorCores/chip -> keep grid=(B,) parallel (1 batch per core).
    # v5e/v6e are single-TC -> fold the batch into one grid step instead.
    try:
        kind = jax.devices()[0].device_kind.lower()
        return ("v7" in kind) or ("7x" in kind)
    except Exception:
        return False


def _pack_params(params):
    sw, sb, cw, cb, w1, b1, w2, b2 = params
    wqkv_s = jnp.concatenate([sw[0], sw[1], sw[2]], axis=1)        # (D, 3D)
    bqkv_s = jnp.concatenate([sb[0], sb[1], sb[2]])[None, :]       # (1, 3D)
    wo_s = sw[3].reshape(H, DK, D)                                 # per-head w_o
    bo_s = sb[3][None, :]                                          # (1, D)
    wq_c = cw[0]                                                   # (D, D)
    bq_c = cb[0][None, :]                                          # (1, D)
    wkv_c = jnp.concatenate([cw[1], cw[2]], axis=1)                # (D, 2D)
    bkv_c = jnp.concatenate([cb[1], cb[2]])[None, :]               # (1, 2D)
    wo_c = cw[3].reshape(H, DK, D)
    bo_c = cb[3][None, :]
    return (wqkv_s, bqkv_s, wo_s, bo_s,
            wq_c, bq_c, wkv_c, bkv_c, wo_c, bo_c,
            w1, b1, w2, b2)


def decoder_block(dec, enc, tgt_mask, src_mask, params):
    packed = _pack_params(params)

    grid_b = B if _use_batch_grid() else 1   # grid=(B,) only on multi-TC v7x
    nb = B // grid_b

    def batched(trailing):
        return pl.BlockSpec((nb,) + trailing, lambda b: (b, 0, 0))

    def full(arr):
        n_dims = arr.ndim
        return pl.BlockSpec(arr.shape, lambda b, n=n_dims: (0,) * n)

    in_specs = [
        batched((S, D)),          # dec
        batched((S_ENC, D)),      # enc
        batched((S, S)),          # tgt_mask
        batched((S, S_ENC)),      # src_mask
    ] + [full(a) for a in packed]

    operands = (dec, enc, tgt_mask, src_mask) + packed

    flops = int(
        2 * B * S * D * (3 * D)            # fused self-attn QKV projection
        + 2 * B * S * D * D                # cross-attn Q projection
        + 2 * B * S_ENC * D * (2 * D)      # fused cross-attn KV projection
        + 2 * B * H * S * S * DK * 2       # self-attn scores + PV
        + 2 * B * H * S * S_ENC * DK * 2   # cross-attn scores + PV
        + 2 * 2 * B * S * D * D            # two w_o applications
        + 2 * B * S * D * F * 2)           # FFN
    transcendentals = int(B * H * S * (S + S_ENC))
    bytes_accessed = int(sum(int(a.size) for a in operands) * 4 + B * S * D * 4)

    return pl.pallas_call(
        functools.partial(decoder_block_kernel, nb=nb),
        out_shape=jax.ShapeDtypeStruct((B, S, D), jnp.float32),
        grid=(grid_b,),
        in_specs=in_specs,
        out_specs=batched((S, D)),
        compiler_params=pltpu.CompilerParams(dimension_semantics=("parallel",)),
        cost_estimate=pl.CostEstimate(flops=flops,
                                      transcendentals=transcendentals,
                                      bytes_accessed=bytes_accessed),
    )(*operands)


# -------------------- pure-JAX reference --------------------
def reference(dec, enc, tgt_mask, src_mask, params):
    sw, sb, cw, cb, w1, b1, w2, b2 = params

    def ln(x):
        mu = jnp.mean(x, -1, keepdims=True)
        var = jnp.sum((x - mu) ** 2, -1, keepdims=True) / (x.shape[-1] - 1)
        return (x - mu) / jnp.sqrt(var + EPS)

    def mha(q_in, kv_in, mask, w, b):
        q = q_in @ w[0] + b[0]
        k = kv_in @ w[1] + b[1]
        v = kv_in @ w[2] + b[2]
        Bq, Sq, _ = q.shape
        Sk = k.shape[1]
        qh = q.reshape(Bq, Sq, H, DK).transpose(0, 2, 1, 3)
        kh = k.reshape(Bq, Sk, H, DK).transpose(0, 2, 1, 3)
        vh = v.reshape(Bq, Sk, H, DK).transpose(0, 2, 1, 3)
        s = jnp.einsum("bhqd,bhkd->bhqk", qh, kh) / math.sqrt(DK)
        s = jnp.where(mask[:, None, :, :] == 0.0, NEG_INF, s)
        p = jax.nn.softmax(s, axis=-1)
        o = jnp.einsum("bhqk,bhkd->bhqd", p, vh)
        o = o.transpose(0, 2, 1, 3).reshape(Bq, Sq, D)
        return o @ w[3] + b[3]

    x_in = dec
    x = ln(x_in)
    x = mha(x, x, tgt_mask, sw, sb) + x_in
    x_res = x
    x = x_res + mha(ln(x), enc, src_mask, cw, cb)
    x_res2 = x
    ff = jnp.maximum(x @ w1 + b1[0], 0.0) @ w2 + b2[0]
    return ff + x_res2


# -------------------- driver --------------------
if __name__ == "__main__":
    key = jax.random.PRNGKey(0)
    ks = jax.random.split(key, 12)

    dec = jax.random.normal(ks[0], (B, S, D), jnp.float32)
    enc = jax.random.normal(ks[1], (B, S_ENC, D), jnp.float32)
    # causal target mask, all-ones source mask (0/1 floats)
    tgt_mask = jnp.broadcast_to(
        jnp.tril(jnp.ones((S, S), jnp.float32)), (B, S, S)).astype(jnp.float32)
    src_mask = jnp.ones((B, S, S_ENC), jnp.float32)

    scale = 0.05
    params = (
        scale * jax.random.normal(ks[2], (4, D, D), jnp.float32),   # self-attn w (q,k,v,o)
        scale * jax.random.normal(ks[3], (4, D), jnp.float32),      # self-attn b
        scale * jax.random.normal(ks[4], (4, D, D), jnp.float32),   # cross-attn w
        scale * jax.random.normal(ks[5], (4, D), jnp.float32),      # cross-attn b
        scale * jax.random.normal(ks[6], (D, F), jnp.float32),      # fc1 W
        scale * jax.random.normal(ks[7], (1, F), jnp.float32),      # fc1 b
        scale * jax.random.normal(ks[8], (F, D), jnp.float32),      # fc2 W
        scale * jax.random.normal(ks[9], (1, D), jnp.float32),      # fc2 b
    )

    out = decoder_block(dec, enc, tgt_mask, src_mask, params)
    out = jax.block_until_ready(out)

    ref = jax.block_until_ready(reference(dec, enc, tgt_mask, src_mask, params))
    assert out.shape == (B, S, D)
    assert jnp.allclose(out, ref, atol=1e-4, rtol=1e-4), (
        f"max abs err {jnp.max(jnp.abs(out - ref))}")

    print("KERNEL_OK")
</pallas_src>

<mosaic_0001>
module attributes {stable_mosaic.version = 11 : i64} {
  func.func @decoder_block_kernel(%arg0: i32, %arg1: memref<2x8x32xf32, #tpu.memory_space<vmem>>, %arg2: memref<2x8x32xf32, #tpu.memory_space<vmem>>, %arg3: memref<2x8x8xf32, #tpu.memory_space<vmem>>, %arg4: memref<2x8x8xf32, #tpu.memory_space<vmem>>, %arg5: memref<32x96xf32, #tpu.memory_space<vmem>>, %arg6: memref<1x96xf32, #tpu.memory_space<vmem>>, %arg7: memref<4x8x32xf32, #tpu.memory_space<vmem>>, %arg8: memref<1x32xf32, #tpu.memory_space<vmem>>, %arg9: memref<32x32xf32, #tpu.memory_space<vmem>>, %arg10: memref<1x32xf32, #tpu.memory_space<vmem>>, %arg11: memref<32x64xf32, #tpu.memory_space<vmem>>, %arg12: memref<1x64xf32, #tpu.memory_space<vmem>>, %arg13: memref<4x8x32xf32, #tpu.memory_space<vmem>>, %arg14: memref<1x32xf32, #tpu.memory_space<vmem>>, %arg15: memref<32x64xf32, #tpu.memory_space<vmem>>, %arg16: memref<1x64xf32, #tpu.memory_space<vmem>>, %arg17: memref<64x32xf32, #tpu.memory_space<vmem>>, %arg18: memref<1x32xf32, #tpu.memory_space<vmem>>, %arg19: memref<2x8x32xf32, #tpu.memory_space<vmem>>) attributes {dimension_semantics = [#tpu.dimension_semantics<parallel>], iteration_bounds = array<i64: 1>, scalar_prefetch = 0 : i64, scratch_operands = 0 : i64, tpu.core_type = #tpu.core_type<tc>, window_params = [{transform_indices = @transform_0, window_bounds = array<i64: 2, 8, 32>}, {transform_indices = @transform_1, window_bounds = array<i64: 2, 8, 32>}, {transform_indices = @transform_2, window_bounds = array<i64: 2, 8, 8>}, {transform_indices = @transform_3, window_bounds = array<i64: 2, 8, 8>}, {pipeline_mode = #tpu.pipeline_mode<synchronous>, transform_indices = @transform_4, window_bounds = array<i64: 32, 96>}, {pipeline_mode = #tpu.pipeline_mode<synchronous>, transform_indices = @transform_5, window_bounds = array<i64: 1, 96>}, {pipeline_mode = #tpu.pipeline_mode<synchronous>, transform_indices = @transform_6, window_bounds = array<i64: 4, 8, 32>}, {pipeline_mode = #tpu.pipeline_mode<synchronous>, transform_indices = @transform_7, window_bounds = array<i64: 1, 32>}, {pipeline_mode = #tpu.pipeline_mode<synchronous>, transform_indices = @transform_8, window_bounds = array<i64: 32, 32>}, {pipeline_mode = #tpu.pipeline_mode<synchronous>, transform_indices = @transform_9, window_bounds = array<i64: 1, 32>}, {pipeline_mode = #tpu.pipeline_mode<synchronous>, transform_indices = @transform_10, window_bounds = array<i64: 32, 64>}, {pipeline_mode = #tpu.pipeline_mode<synchronous>, transform_indices = @transform_11, window_bounds = array<i64: 1, 64>}, {pipeline_mode = #tpu.pipeline_mode<synchronous>, transform_indices = @transform_12, window_bounds = array<i64: 4, 8, 32>}, {pipeline_mode = #tpu.pipeline_mode<synchronous>, transform_indices = @transform_13, window_bounds = array<i64: 1, 32>}, {pipeline_mode = #tpu.pipeline_mode<synchronous>, transform_indices = @transform_14, window_bounds = array<i64: 32, 64>}, {pipeline_mode = #tpu.pipeline_mode<synchronous>, transform_indices = @transform_15, window_bounds = array<i64: 1, 64>}, {pipeline_mode = #tpu.pipeline_mode<synchronous>, transform_indices = @transform_16, window_bounds = array<i64: 64, 32>}, {pipeline_mode = #tpu.pipeline_mode<synchronous>, transform_indices = @transform_17, window_bounds = array<i64: 1, 32>}, {transform_indices = @transform_18, window_bounds = array<i64: 2, 8, 32>}]} {
    %c0 = arith.constant 0 : index
    %c0_0 = arith.constant 0 : index
    %c0_1 = arith.constant 0 : index
    %0 = vector.load %arg1[%c0, %c0_0, %c0_1] : memref<2x8x32xf32, #tpu.memory_space<vmem>>, vector<2x8x32xf32>
    %1 = vector.shape_cast %0 : vector<2x8x32xf32> to vector<16x32xf32>
    %c0_2 = arith.constant 0 : index
    %c0_3 = arith.constant 0 : index
    %c0_4 = arith.constant 0 : index
    %2 = vector.load %arg2[%c0_2, %c0_3, %c0_4] : memref<2x8x32xf32, #tpu.memory_space<vmem>>, vector<2x8x32xf32>
    %3 = vector.shape_cast %2 : vector<2x8x32xf32> to vector<16x32xf32>
    %cst = arith.constant dense<0.000000e+00> : vector<16xf32>
    %4 = vector.multi_reduction <add>, %1, %cst [1] : vector<16x32xf32> to vector<16xf32>
    %5 = vector.shape_cast %4 : vector<16xf32> to vector<16x1xf32>
    %cst_5 = arith.constant 3.200000e+01 : f32
    %6 = vector.broadcast %cst_5 : f32 to vector<16x1xf32>
    %7 = arith.divf %5, %6 : vector<16x1xf32>
    %8 = vector.broadcast %7 : vector<16x1xf32> to vector<16x32xf32>
    %9 = arith.subf %1, %8 : vector<16x32xf32>
    %10 = arith.mulf %9, %9 : vector<16x32xf32>
    %cst_6 = arith.constant dense<0.000000e+00> : vector<16xf32>
    %11 = vector.multi_reduction <add>, %10, %cst_6 [1] : vector<16x32xf32> to vector<16xf32>
    %12 = vector.shape_cast %11 : vector<16xf32> to vector<16x1xf32>
    %cst_7 = arith.constant 0.0322580636 : f32
    %13 = vector.broadcast %cst_7 : f32 to vector<16x1xf32>
    %14 = arith.mulf %12, %13 : vector<16x1xf32>
    %15 = vector.broadcast %7 : vector<16x1xf32> to vector<16x32xf32>
    %16 = arith.subf %1, %15 : vector<16x32xf32>
    %cst_8 = arith.constant 9.99999997E-7 : f32
    %17 = vector.broadcast %cst_8 : f32 to vector<16x1xf32>
    %18 = arith.addf %14, %17 : vector<16x1xf32>
    %19 = math.rsqrt %18 : vector<16x1xf32>
    %20 = vector.broadcast %19 : vector<16x1xf32> to vector<16x32xf32>
    %21 = arith.mulf %16, %20 : vector<16x32xf32>
    %c0_9 = arith.constant 0 : index
    %c0_10 = arith.constant 0 : index
    %22 = vector.load %arg5[%c0_9, %c0_10] : memref<32x96xf32, #tpu.memory_space<vmem>>, vector<32x96xf32>
    %cst_11 = arith.constant dense<0.000000e+00> : vector<16x96xf32>
    %23 = tpu.matmul %21, %22, %cst_11 {dimension_numbers = #tpu.dot_dimension_numbers<[1], [0], [0], [1], [0, 0, 1, 1], [], []>} : vector<16x32xf32>, vector<32x96xf32>, vector<16x96xf32> -> vector<16x96xf32>
    %c0_12 = arith.constant 0 : index
    %c0_13 = arith.constant 0 : index
    %24 = vector.load %arg6[%c0_12, %c0_13] : memref<1x96xf32, #tpu.memory_space<vmem>>, vector<1x96xf32>
    %25 = vector.broadcast %24 : vector<1x96xf32> to vector<16x96xf32>
    %26 = arith.addf %23, %25 : vector<16x96xf32>
    %27 = vector.extract_strided_slice %26 {offsets = [0, 0], sizes = [16, 32], strides = [1, 1]} : vector<16x96xf32> to vector<16x32xf32>
    %28 = vector.extract_strided_slice %26 {offsets = [0, 32], sizes = [16, 32], strides = [1, 1]} : vector<16x96xf32> to vector<16x32xf32>
    %29 = vector.extract_strided_slice %26 {offsets = [0, 64], sizes = [16, 32], strides = [1, 1]} : vector<16x96xf32> to vector<16x32xf32>
    %30 = vector.extract_strided_slice %27 {offsets = [0, 0], sizes = [8, 32], strides = [1, 1]} : vector<16x32xf32> to vector<8x32xf32>
    %31 = vector.extract_strided_slice %28 {offsets = [0, 0], sizes = [8, 32], strides = [1, 1]} : vector<16x32xf32> to vector<8x32xf32>
    %32 = vector.extract_strided_slice %29 {offsets = [0, 0], sizes = [8, 32], strides = [1, 1]} : vector<16x32xf32> to vector<8x32xf32>
    %c0_14 = arith.constant 0 : index
    %c0_15 = arith.constant 0 : index
    %c0_16 = arith.constant 0 : index
    %33 = vector.load %arg3[%c0_14, %c0_15, %c0_16] : memref<2x8x8xf32, #tpu.memory_space<vmem>>, vector<1x8x8xf32>
    %34 = vector.shape_cast %33 : vector<1x8x8xf32> to vector<8x8xf32>
    %cst_17 = arith.constant 0.000000e+00 : f32
    %35 = vector.broadcast %cst_17 : f32 to vector<8x8xf32>
    %36 = arith.cmpf oeq, %34, %35 : vector<8x8xf32>
    %cst_18 = arith.constant 0.000000e+00 : f32
    %37 = vector.broadcast %cst_18 : f32 to vector<8x32xf32>
    %38 = vector.extract_strided_slice %30 {offsets = [0, 0], sizes = [8, 8], strides = [1, 1]} : vector<8x32xf32> to vector<8x8xf32>
    %39 = vector.extract_strided_slice %31 {offsets = [0, 0], sizes = [8, 8], strides = [1, 1]} : vector<8x32xf32> to vector<8x8xf32>
    %40 = vector.extract_strided_slice %32 {offsets = [0, 0], sizes = [8, 8], strides = [1, 1]} : vector<8x32xf32> to vector<8x8xf32>
    %41 = tpu.transpose %39, [1, 0] : vector<8x8xf32> -> vector<8x8xf32>
    %cst_19 = arith.constant dense<0.000000e+00> : vector<8x8xf32>
    %42 = tpu.matmul %38, %41, %cst_19 {dimension_numbers = #tpu.dot_dimension_numbers<[1], [0], [0], [1], [0, 0, 1, 1], [], []>} : vector<8x8xf32>, vector<8x8xf32>, vector<8x8xf32> -> vector<8x8xf32>
    %cst_20 = arith.constant 0.353553385 : f32
    %43 = vector.broadcast %cst_20 : f32 to vector<8x8xf32>
    %44 = arith.mulf %42, %43 : vector<8x8xf32>
    %cst_21 = arith.constant -1.000000e+09 : f32
    %45 = vector.broadcast %cst_21 : f32 to vector<8x8xf32>
    %46 = arith.select %36, %45, %44 : vector<8x8xi1>, vector<8x8xf32>
    %cst_22 = arith.constant dense<0xFF800000> : vector<8xf32>
    %47 = vector.multi_reduction <maximumf>, %46, %cst_22 [1] : vector<8x8xf32> to vector<8xf32>
    %48 = vector.shape_cast %47 : vector<8xf32> to vector<8x1xf32>
    %49 = vector.broadcast %48 : vector<8x1xf32> to vector<8x8xf32>
    %50 = arith.subf %46, %49 : vector<8x8xf32>
    %51 = math.exp %50 : vector<8x8xf32>
    %cst_23 = arith.constant dense<0.000000e+00> : vector<8xf32>
    %52 = vector.multi_reduction <add>, %51, %cst_23 [1] : vector<8x8xf32> to vector<8xf32>
    %53 = vector.shape_cast %52 : vector<8xf32> to vector<8x1xf32>
    %54 = tpu.reciprocal %53 : vector<8x1xf32> -> vector<8x1xf32>
    %55 = vector.broadcast %54 : vector<8x1xf32> to vector<8x8xf32>
    %56 = arith.mulf %51, %55 : vector<8x8xf32>
    %cst_24 = arith.constant dense<0.000000e+00> : vector<8x8xf32>
    %57 = tpu.matmul %56, %40, %cst_24 {dimension_numbers = #tpu.dot_dimension_numbers<[1], [0], [0], [1], [0, 0, 1, 1], [], []>} : vector<8x8xf32>, vector<8x8xf32>, vector<8x8xf32> -> vector<8x8xf32>
    %c0_25 = arith.constant 0 : index
    %c0_26 = arith.constant 0 : index
    %c0_27 = arith.constant 0 : index
    %58 = vector.load %arg7[%c0_25, %c0_26, %c0_27] : memref<4x8x32xf32, #tpu.memory_space<vmem>>, vector<1x8x32xf32>
    %59 = vector.shape_cast %58 : vector<1x8x32xf32> to vector<8x32xf32>
    %cst_28 = arith.constant dense<0.000000e+00> : vector<8x32xf32>
    %60 = tpu.matmul %57, %59, %cst_28 {dimension_numbers = #tpu.dot_dimension_numbers<[1], [0], [0], [1], [0, 0, 1, 1], [], []>} : vector<8x8xf32>, vector<8x32xf32>, vector<8x32xf32> -> vector<8x32xf32>
    %61 = arith.addf %37, %60 : vector<8x32xf32>
    %62 = vector.extract_strided_slice %30 {offsets = [0, 8], sizes = [8, 8], strides = [1, 1]} : vector<8x32xf32> to vector<8x8xf32>
    %63 = vector.extract_strided_slice %31 {offsets = [0, 8], sizes = [8, 8], strides = [1, 1]} : vector<8x32xf32> to vector<8x8xf32>
    %64 = vector.extract_strided_slice %32 {offsets = [0, 8], sizes = [8, 8], strides = [1, 1]} : vector<8x32xf32> to vector<8x8xf32>
    %65 = tpu.transpose %63, [1, 0] : vector<8x8xf32> -> vector<8x8xf32>
    %cst_29 = arith.constant dense<0.000000e+00> : vector<8x8xf32>
    %66 = tpu.matmul %62, %65, %cst_29 {dimension_numbers = #tpu.dot_dimension_numbers<[1], [0], [0], [1], [0, 0, 1, 1], [], []>} : vector<8x8xf32>, vector<8x8xf32>, vector<8x8xf32> -> vector<8x8xf32>
    %cst_30 = arith.constant 0.353553385 : f32
    %67 = vector.broadcast %cst_30 : f32 to vector<8x8xf32>
    %68 = arith.mulf %66, %67 : vector<8x8xf32>
    %cst_31 = arith.constant -1.000000e+09 : f32
    %69 = vector.broadcast %cst_31 : f32 to vector<8x8xf32>
    %70 = arith.select %36, %69, %68 : vector<8x8xi1>, vector<8x8xf32>
    %cst_32 = arith.constant dense<0xFF800000> : vector<8xf32>
    %71 = vector.multi_reduction <maximumf>, %70, %cst_32 [1] : vector<8x8xf32> to vector<8xf32>
    %72 = vector.shape_cast %71 : vector<8xf32> to vector<8x1xf32>
    %73 = vector.broadcast %72 : vector<8x1xf32> to vector<8x8xf32>
    %74 = arith.subf %70, %73 : vector<8x8xf32>
    %75 = math.exp %74 : vector<8x8xf32>
    %cst_33 = arith.constant dense<0.000000e+00> : vector<8xf32>
    %76 = vector.multi_reduction <add>, %75, %cst_33 [1] : vector<8x8xf32> to vector<8xf32>
    %77 = vector.shape_cast %76 : vector<8xf32> to vector<8x1xf32>
    %78 = tpu.reciprocal %77 : vector<8x1xf32> -> vector<8x1xf32>
    %79 = vector.broadcast %78 : vector<8x1xf32> to vector<8x8xf32>
    %80 = arith.mulf %75, %79 : vector<8x8xf32>
    %cst_34 = arith.constant dense<0.000000e+00> : vector<8x8xf32>
    %81 = tpu.matmul %80, %64, %cst_34 {dimension_numbers = #tpu.dot_dimension_numbers<[1], [0], [0], [1], [0, 0, 1, 1], [], []>} : vector<8x8xf32>, vector<8x8xf32>, vector<8x8xf32> -> vector<8x8xf32>
    %c1 = arith.constant 1 : index
    %c0_35 = arith.constant 0 : index
    %c0_36 = arith.constant 0 : index
    %82 = vector.load %arg7[%c1, %c0_35, %c0_36] : memref<4x8x32xf32, #tpu.memory_space<vmem>>, vector<1x8x32xf32>
    %83 = vector.shape_cast %82 : vector<1x8x32xf32> to vector<8x32xf32>
    %cst_37 = arith.constant dense<0.000000e+00> : vector<8x32xf32>
    %84 = tpu.matmul %81, %83, %cst_37 {dimension_numbers = #tpu.dot_dimension_numbers<[1], [0], [0], [1], [0, 0, 1, 1], [], []>} : vector<8x8xf32>, vector<8x32xf32>, vector<8x32xf32> -> vector<8x32xf32>
    %85 = arith.addf %61, %84 : vector<8x32xf32>
    %86 = vector.extract_strided_slice %30 {offsets = [0, 16], sizes = [8, 8], strides = [1, 1]} : vector<8x32xf32> to vector<8x8xf32>
    %87 = vector.extract_strided_slice %31 {offsets = [0, 16], sizes = [8, 8], strides = [1, 1]} : vector<8x32xf32> to vector<8x8xf32>
    %88 = vector.extract_strided_slice %32 {offsets = [0, 16], sizes = [8, 8], strides = [1, 1]} : vector<8x32xf32> to vector<8x8xf32>
    %89 = tpu.transpose %87, [1, 0] : vector<8x8xf32> -> vector<8x8xf32>
    %cst_38 = arith.constant dense<0.000000e+00> : vector<8x8xf32>
    %90 = tpu.matmul %86, %89, %cst_38 {dimension_numbers = #tpu.dot_dimension_numbers<[1], [0], [0], [1], [0, 0, 1, 1], [], []>} : vector<8x8xf32>, vector<8x8xf32>, vector<8x8xf32> -> vector<8x8xf32>
    %cst_39 = arith.constant 0.353553385 : f32
    %91 = vector.broadcast %cst_39 : f32 to vector<8x8xf32>
    %92 = arith.mulf %90, %91 : vector<8x8xf32>
    %cst_40 = arith.constant -1.000000e+09 : f32
    %93 = vector.broadcast %cst_40 : f32 to vector<8x8xf32>
    %94 = arith.select %36, %93, %92 : vector<8x8xi1>, vector<8x8xf32>
    %cst_41 = arith.constant dense<0xFF800000> : vector<8xf32>
    %95 = vector.multi_reduction <maximumf>, %94, %cst_41 [1] : vector<8x8xf32> to vector<8xf32>
    %96 = vector.shape_cast %95 : vector<8xf32> to vector<8x1xf32>
    %97 = vector.broadcast %96 : vector<8x1xf32> to vector<8x8xf32>
    %98 = arith.subf %94, %97 : vector<8x8xf32>
    %99 = math.exp %98 : vector<8x8xf32>
    %cst_42 = arith.constant dense<0.000000e+00> : vector<8xf32>
    %100 = vector.multi_reduction <add>, %99, %cst_42 [1] : vector<8x8xf32> to vector<8xf32>
    %101 = vector.shape_cast %100 : vector<8xf32> to vector<8x1xf32>
    %102 = tpu.reciprocal %101 : vector<8x1xf32> -> vector<8x1xf32>
    %103 = vector.broadcast %102 : vector<8x1xf32> to vector<8x8xf32>
    %104 = arith.mulf %99, %103 : vector<8x8xf32>
    %cst_43 = arith.constant dense<0.000000e+00> : vector<8x8xf32>
    %105 = tpu.matmul %104, %88, %cst_43 {dimension_numbers = #tpu.dot_dimension_numbers<[1], [0], [0], [1], [0, 0, 1, 1], [], []>} : vector<8x8xf32>, vector<8x8xf32>, vector<8x8xf32> -> vector<8x8xf32>
    %c2 = arith.constant 2 : index
    %c0_44 = arith.constant 0 : index
    %c0_45 = arith.constant 0 : index
    %106 = vector.load %arg7[%c2, %c0_44, %c0_45] : memref<4x8x32xf32, #tpu.memory_space<vmem>>, vector<1x8x32xf32>
    %107 = vector.shape_cast %106 : vector<1x8x32xf32> to vector<8x32xf32>
    %cst_46 = arith.constant dense<0.000000e+00> : vector<8x32xf32>
    %108 = tpu.matmul %105, %107, %cst_46 {dimension_numbers = #tpu.dot_dimension_numbers<[1], [0], [0], [1], [0, 0, 1, 1], [], []>} : vector<8x8xf32>, vector<8x32xf32>, vector<8x32xf32> -> vector<8x32xf32>
    %109 = arith.addf %85, %108 : vector<8x32xf32>
    %110 = vector.extract_strided_slice %30 {offsets = [0, 24], sizes = [8, 8], strides = [1, 1]} : vector<8x32xf32> to vector<8x8xf32>
    %111 = vector.extract_strided_slice %31 {offsets = [0, 24], sizes = [8, 8], strides = [1, 1]} : vector<8x32xf32> to vector<8x8xf32>
    %112 = vector.extract_strided_slice %32 {offsets = [0, 24], sizes = [8, 8], strides = [1, 1]} : vector<8x32xf32> to vector<8x8xf32>
    %113 = tpu.transpose %111, [1, 0] : vector<8x8xf32> -> vector<8x8xf32>
    %cst_47 = arith.constant dense<0.000000e+00> : vector<8x8xf32>
    %114 = tpu.matmul %110, %113, %cst_47 {dimension_numbers = #tpu.dot_dimension_numbers<[1], [0], [0], [1], [0, 0, 1, 1], [], []>} : vector<8x8xf32>, vector<8x8xf32>, vector<8x8xf32> -> vector<8x8xf32>
    %cst_48 = arith.constant 0.353553385 : f32
    %115 = vector.broadcast %cst_48 : f32 to vector<8x8xf32>
    %116 = arith.mulf %114, %115 : vector<8x8xf32>
    %cst_49 = arith.constant -1.000000e+09 : f32
    %117 = vector.broadcast %cst_49 : f32 to vector<8x8xf32>
    %118 = arith.select %36, %117, %116 : vector<8x8xi1>, vector<8x8xf32>
    %cst_50 = arith.constant dense<0xFF800000> : vector<8xf32>
    %119 = vector.multi_reduction <maximumf>, %118, %cst_50 [1] : vector<8x8xf32> to vector<8xf32>
    %120 = vector.shape_cast %119 : vector<8xf32> to vector<8x1xf32>
    %121 = vector.broadcast %120 : vector<8x1xf32> to vector<8x8xf32>
    %122 = arith.subf %118, %121 : vector<8x8xf32>
    %123 = math.exp %122 : vector<8x8xf32>
    %cst_51 = arith.constant dense<0.000000e+00> : vector<8xf32>
    %124 = vector.multi_reduction <add>, %123, %cst_51 [1] : vector<8x8xf32> to vector<8xf32>
    %125 = vector.shape_cast %124 : vector<8xf32> to vector<8x1xf32>
    %126 = tpu.reciprocal %125 : vector<8x1xf32> -> vector<8x1xf32>
    %127 = vector.broadcast %126 : vector<8x1xf32> to vector<8x8xf32>
    %128 = arith.mulf %123, %127 : vector<8x8xf32>
    %cst_52 = arith.constant dense<0.000000e+00> : vector<8x8xf32>
    %129 = tpu.matmul %128, %112, %cst_52 {dimension_numbers = #tpu.dot_dimension_numbers<[1], [0], [0], [1], [0, 0, 1, 1], [], []>} : vector<8x8xf32>, vector<8x8xf32>, vector<8x8xf32> -> vector<8x8xf32>
    %c3 = arith.constant 3 : index
    %c0_53 = arith.constant 0 : index
    %c0_54 = arith.constant 0 : index
    %130 = vector.load %arg7[%c3, %c0_53, %c0_54] : memref<4x8x32xf32, #tpu.memory_space<vmem>>, vector<1x8x32xf32>
    %131 = vector.shape_cast %130 : vector<1x8x32xf32> to vector<8x32xf32>
    %cst_55 = arith.constant dense<0.000000e+00> : vector<8x32xf32>
    %132 = tpu.matmul %129, %131, %cst_55 {dimension_numbers = #tpu.dot_dimension_numbers<[1], [0], [0], [1], [0, 0, 1, 1], [], []>} : vector<8x8xf32>, vector<8x32xf32>, vector<8x32xf32> -> vector<8x32xf32>
    %133 = arith.addf %109, %132 : vector<8x32xf32>
    %134 = vector.extract_strided_slice %27 {offsets = [8, 0], sizes = [8, 32], strides = [1, 1]} : vector<16x32xf32> to vector<8x32xf32>
    %135 = vector.extract_strided_slice %28 {offsets = [8, 0], sizes = [8, 32], strides = [1, 1]} : vector<16x32xf32> to vector<8x32xf32>
    %136 = vector.extract_strided_slice %29 {offsets = [8, 0], sizes = [8, 32], strides = [1, 1]} : vector<16x32xf32> to vector<8x32xf32>
    %c1_56 = arith.constant 1 : index
    %c0_57 = arith.constant 0 : index
    %c0_58 = arith.constant 0 : index
    %137 = vector.load %arg3[%c1_56, %c0_57, %c0_58] : memref<2x8x8xf32, #tpu.memory_space<vmem>>, vector<1x8x8xf32>
    %138 = vector.shape_cast %137 : vector<1x8x8xf32> to vector<8x8xf32>
    %cst_59 = arith.constant 0.000000e+00 : f32
    %139 = vector.broadcast %cst_59 : f32 to vector<8x8xf32>
    %140 = arith.cmpf oeq, %138, %139 : vector<8x8xf32>
    %cst_60 = arith.constant 0.000000e+00 : f32
    %141 = vector.broadcast %cst_60 : f32 to vector<8x32xf32>
    %142 = vector.extract_strided_slice %134 {offsets = [0, 0], sizes = [8, 8], strides = [1, 1]} : vector<8x32xf32> to vector<8x8xf32>
    %143 = vector.extract_strided_slice %135 {offsets = [0, 0], sizes = [8, 8], strides = [1, 1]} : vector<8x32xf32> to vector<8x8xf32>
    %144 = vector.extract_strided_slice %136 {offsets = [0, 0], sizes = [8, 8], strides = [1, 1]} : vector<8x32xf32> to vector<8x8xf32>
    %145 = tpu.transpose %143, [1, 0] : vector<8x8xf32> -> vector<8x8xf32>
    %cst_61 = arith.constant dense<0.000000e+00> : vector<8x8xf32>
    %146 = tpu.matmul %142, %145, %cst_61 {dimension_numbers = #tpu.dot_dimension_numbers<[1], [0], [0], [1], [0, 0, 1, 1], [], []>} : vector<8x8xf32>, vector<8x8xf32>, vector<8x8xf32> -> vector<8x8xf32>
    %cst_62 = arith.constant 0.353553385 : f32
    %147 = vector.broadcast %cst_62 : f32 to vector<8x8xf32>
    %148 = arith.mulf %146, %147 : vector<8x8xf32>
    %cst_63 = arith.constant -1.000000e+09 : f32
    %149 = vector.broadcast %cst_63 : f32 to vector<8x8xf32>
    %150 = arith.select %140, %149, %148 : vector<8x8xi1>, vector<8x8xf32>
    %cst_64 = arith.constant dense<0xFF800000> : vector<8xf32>
    %151 = vector.multi_reduction <maximumf>, %150, %cst_64 [1] : vector<8x8xf32> to vector<8xf32>
    %152 = vector.shape_cast %151 : vector<8xf32> to vector<8x1xf32>
    %153 = vector.broadcast %152 : vector<8x1xf32> to vector<8x8xf32>
    %154 = arith.subf %150, %153 : vector<8x8xf32>
    %155 = math.exp %154 : vector<8x8xf32>
    %cst_65 = arith.constant dense<0.000000e+00> : vector<8xf32>
    %156 = vector.multi_reduction <add>, %155, %cst_65 [1] : vector<8x8xf32> to vector<8xf32>
    %157 = vector.shape_cast %156 : vector<8xf32> to vector<8x1xf32>
    %158 = tpu.reciprocal %157 : vector<8x1xf32> -> vector<8x1xf32>
    %159 = vector.broadcast %158 : vector<8x1xf32> to vector<8x8xf32>
    %160 = arith.mulf %155, %159 : vector<8x8xf32>
    %cst_66 = arith.constant dense<0.000000e+00> : vector<8x8xf32>
    %161 = tpu.matmul %160, %144, %cst_66 {dimension_numbers = #tpu.dot_dimension_numbers<[1], [0], [0], [1], [0, 0, 1, 1], [], []>} : vector<8x8xf32>, vector<8x8xf32>, vector<8x8xf32> -> vector<8x8xf32>
    %c0_67 = arith.constant 0 : index
    %c0_68 = arith.constant 0 : index
    %c0_69 = arith.constant 0 : index
    %162 = vector.load %arg7[%c0_67, %c0_68, %c0_69] : memref<4x8x32xf32, #tpu.memory_space<vmem>>, vector<1x8x32xf32>
    %163 = vector.shape_cast %162 : vector<1x8x32xf32> to vector<8x32xf32>
    %cst_70 = arith.constant dense<0.000000e+00> : vector<8x32xf32>
    %164 = tpu.matmul %161, %163, %cst_70 {dimension_numbers = #tpu.dot_dimension_numbers<[1], [0], [0], [1], [0, 0, 1, 1], [], []>} : vector<8x8xf32>, vector<8x32xf32>, vector<8x32xf32> -> vector<8x32xf32>
    %165 = arith.addf %141, %164 : vector<8x32xf32>
    %166 = vector.extract_strided_slice %134 {offsets = [0, 8], sizes = [8, 8], strides = [1, 1]} : vector<8x32xf32> to vector<8x8xf32>
    %167 = vector.extract_strided_slice %135 {offsets = [0, 8], sizes = [8, 8], strides = [1, 1]} : vector<8x32xf32> to vector<8x8xf32>
    %168 = vector.extract_strided_slice %136 {offsets = [0, 8], sizes = [8, 8], strides = [1, 1]} : vector<8x32xf32> to vector<8x8xf32>
    %169 = tpu.transpose %167, [1, 0] : vector<8x8xf32> -> vector<8x8xf32>
    %cst_71 = arith.constant dense<0.000000e+00> : vector<8x8xf32>
    %170 = tpu.matmul %166, %169, %cst_71 {dimension_numbers = #tpu.dot_dimension_numbers<[1], [0], [0], [1], [0, 0, 1, 1], [], []>} : vector<8x8xf32>, vector<8x8xf32>, vector<8x8xf32> -> vector<8x8xf32>
    %cst_72 = arith.constant 0.353553385 : f32
    %171 = vector.broadcast %cst_72 : f32 to vector<8x8xf32>
    %172 = arith.mulf %170, %171 : vector<8x8xf32>
    %cst_73 = arith.constant -1.000000e+09 : f32
    %173 = vector.broadcast %cst_73 : f32 to vector<8x8xf32>
    %174 = arith.select %140, %173, %172 : vector<8x8xi1>, vector<8x8xf32>
    %cst_74 = arith.constant dense<0xFF800000> : vector<8xf32>
    %175 = vector.multi_reduction <maximumf>, %174, %cst_74 [1] : vector<8x8xf32> to vector<8xf32>
    %176 = vector.shape_cast %175 : vector<8xf32> to vector<8x1xf32>
    %177 = vector.broadcast %176 : vector<8x1xf32> to vector<8x8xf32>
    %178 = arith.subf %174, %177 : vector<8x8xf32>
    %179 = math.exp %178 : vector<8x8xf32>
    %cst_75 = arith.constant dense<0.000000e+00> : vector<8xf32>
    %180 = vector.multi_reduction <add>, %179, %cst_75 [1] : vector<8x8xf32> to vector<8xf32>
    %181 = vector.shape_cast %180 : vector<8xf32> to vector<8x1xf32>
    %182 = tpu.reciprocal %181 : vector<8x1xf32> -> vector<8x1xf32>
    %183 = vector.broadcast %182 : vector<8x1xf32> to vector<8x8xf32>
    %184 = arith.mulf %179, %183 : vector<8x8xf32>
    %cst_76 = arith.constant dense<0.000000e+00> : vector<8x8xf32>
    %185 = tpu.matmul %184, %168, %cst_76 {dimension_numbers = #tpu.dot_dimension_numbers<[1], [0], [0], [1], [0, 0, 1, 1], [], []>} : vector<8x8xf32>, vector<8x8xf32>, vector<8x8xf32> -> vector<8x8xf32>
    %c1_77 = arith.constant 1 : index
    %c0_78 = arith.constant 0 : index
    %c0_79 = arith.constant 0 : index
    %186 = vector.load %arg7[%c1_77, %c0_78, %c0_79] : memref<4x8x32xf32, #tpu.memory_space<vmem>>, vector<1x8x32xf32>
    %187 = vector.shape_cast %186 : vector<1x8x32xf32> to vector<8x32xf32>
    %cst_80 = arith.constant dense<0.000000e+00> : vector<8x32xf32>
    %188 = tpu.matmul %185, %187, %cst_80 {dimension_numbers = #tpu.dot_dimension_numbers<[1], [0], [0], [1], [0, 0, 1, 1], [], []>} : vector<8x8xf32>, vector<8x32xf32>, vector<8x32xf32> -> vector<8x32xf32>
    %189 = arith.addf %165, %188 : vector<8x32xf32>
    %190 = vector.extract_strided_slice %134 {offsets = [0, 16], sizes = [8, 8], strides = [1, 1]} : vector<8x32xf32> to vector<8x8xf32>
    %191 = vector.extract_strided_slice %135 {offsets = [0, 16], sizes = [8, 8], strides = [1, 1]} : vector<8x32xf32> to vector<8x8xf32>
    %192 = vector.extract_strided_slice %136 {offsets = [0, 16], sizes = [8, 8], strides = [1, 1]} : vector<8x32xf32> to vector<8x8xf32>
    %193 = tpu.transpose %191, [1, 0] : vector<8x8xf32> -> vector<8x8xf32>
    %cst_81 = arith.constant dense<0.000000e+00> : vector<8x8xf32>
    %194 = tpu.matmul %190, %193, %cst_81 {dimension_numbers = #tpu.dot_dimension_numbers<[1], [0], [0], [1], [0, 0, 1, 1], [], []>} : vector<8x8xf32>, vector<8x8xf32>, vector<8x8xf32> -> vector<8x8xf32>
    %cst_82 = arith.constant 0.353553385 : f32
    %195 = vector.broadcast %cst_82 : f32 to vector<8x8xf32>
    %196 = arith.mulf %194, %195 : vector<8x8xf32>
    %cst_83 = arith.constant -1.000000e+09 : f32
    %197 = vector.broadcast %cst_83 : f32 to vector<8x8xf32>
    %198 = arith.select %140, %197, %196 : vector<8x8xi1>, vector<8x8xf32>
    %cst_84 = arith.constant dense<0xFF800000> : vector<8xf32>
    %199 = vector.multi_reduction <maximumf>, %198, %cst_84 [1] : vector<8x8xf32> to vector<8xf32>
    %200 = vector.shape_cast %199 : vector<8xf32> to vector<8x1xf32>
    %201 = vector.broadcast %200 : vector<8x1xf32> to vector<8x8xf32>
    %202 = arith.subf %198, %201 : vector<8x8xf32>
    %203 = math.exp %202 : vector<8x8xf32>
    %cst_85 = arith.constant dense<0.000000e+00> : vector<8xf32>
    %204 = vector.multi_reduction <add>, %203, %cst_85 [1] : vector<8x8xf32> to vector<8xf32>
    %205 = vector.shape_cast %204 : vector<8xf32> to vector<8x1xf32>
    %206 = tpu.reciprocal %205 : vector<8x1xf32> -> vector<8x1xf32>
    %207 = vector.broadcast %206 : vector<8x1xf32> to vector<8x8xf32>
    %208 = arith.mulf %203, %207 : vector<8x8xf32>
    %cst_86 = arith.constant dense<0.000000e+00> : vector<8x8xf32>
    %209 = tpu.matmul %208, %192, %cst_86 {dimension_numbers = #tpu.dot_dimension_numbers<[1], [0], [0], [1], [0, 0, 1, 1], [], []>} : vector<8x8xf32>, vector<8x8xf32>, vector<8x8xf32> -> vector<8x8xf32>
    %c2_87 = arith.constant 2 : index
    %c0_88 = arith.constant 0 : index
    %c0_89 = arith.constant 0 : index
    %210 = vector.load %arg7[%c2_87, %c0_88, %c0_89] : memref<4x8x32xf32, #tpu.memory_space<vmem>>, vector<1x8x32xf32>
    %211 = vector.shape_cast %210 : vector<1x8x32xf32> to vector<8x32xf32>
    %cst_90 = arith.constant dense<0.000000e+00> : vector<8x32xf32>
    %212 = tpu.matmul %209, %211, %cst_90 {dimension_numbers = #tpu.dot_dimension_numbers<[1], [0], [0], [1], [0, 0, 1, 1], [], []>} : vector<8x8xf32>, vector<8x32xf32>, vector<8x32xf32> -> vector<8x32xf32>
    %213 = arith.addf %189, %212 : vector<8x32xf32>
    %214 = vector.extract_strided_slice %134 {offsets = [0, 24], sizes = [8, 8], strides = [1, 1]} : vector<8x32xf32> to vector<8x8xf32>
    %215 = vector.extract_strided_slice %135 {offsets = [0, 24], sizes = [8, 8], strides = [1, 1]} : vector<8x32xf32> to vector<8x8xf32>
    %216 = vector.extract_strided_slice %136 {offsets = [0, 24], sizes = [8, 8], strides = [1, 1]} : vector<8x32xf32> to vector<8x8xf32>
    %217 = tpu.transpose %215, [1, 0] : vector<8x8xf32> -> vector<8x8xf32>
    %cst_91 = arith.constant dense<0.000000e+00> : vector<8x8xf32>
    %218 = tpu.matmul %214, %217, %cst_91 {dimension_numbers = #tpu.dot_dimension_numbers<[1], [0], [0], [1], [0, 0, 1, 1], [], []>} : vector<8x8xf32>, vector<8x8xf32>, vector<8x8xf32> -> vector<8x8xf32>
    %cst_92 = arith.constant 0.353553385 : f32
    %219 = vector.broadcast %cst_92 : f32 to vector<8x8xf32>
    %220 = arith.mulf %218, %219 : vector<8x8xf32>
    %cst_93 = arith.constant -1.000000e+09 : f32
    %221 = vector.broadcast %cst_93 : f32 to vector<8x8xf32>
    %222 = arith.select %140, %221, %220 : vector<8x8xi1>, vector<8x8xf32>
    %cst_94 = arith.constant dense<0xFF800000> : vector<8xf32>
    %223 = vector.multi_reduction <maximumf>, %222, %cst_94 [1] : vector<8x8xf32> to vector<8xf32>
    %224 = vector.shape_cast %223 : vector<8xf32> to vector<8x1xf32>
    %225 = vector.broadcast %224 : vector<8x1xf32> to vector<8x8xf32>
    %226 = arith.subf %222, %225 : vector<8x8xf32>
    %227 = math.exp %226 : vector<8x8xf32>
    %cst_95 = arith.constant dense<0.000000e+00> : vector<8xf32>
    %228 = vector.multi_reduction <add>, %227, %cst_95 [1] : vector<8x8xf32> to vector<8xf32>
    %229 = vector.shape_cast %228 : vector<8xf32> to vector<8x1xf32>
    %230 = tpu.reciprocal %229 : vector<8x1xf32> -> vector<8x1xf32>
    %231 = vector.broadcast %230 : vector<8x1xf32> to vector<8x8xf32>
    %232 = arith.mulf %227, %231 : vector<8x8xf32>
    %cst_96 = arith.constant dense<0.000000e+00> : vector<8x8xf32>
    %233 = tpu.matmul %232, %216, %cst_96 {dimension_numbers = #tpu.dot_dimension_numbers<[1], [0], [0], [1], [0, 0, 1, 1], [], []>} : vector<8x8xf32>, vector<8x8xf32>, vector<8x8xf32> -> vector<8x8xf32>
    %c3_97 = arith.constant 3 : index
    %c0_98 = arith.constant 0 : index
    %c0_99 = arith.constant 0 : index
    %234 = vector.load %arg7[%c3_97, %c0_98, %c0_99] : memref<4x8x32xf32, #tpu.memory_space<vmem>>, vector<1x8x32xf32>
    %235 = vector.shape_cast %234 : vector<1x8x32xf32> to vector<8x32xf32>
    %cst_100 = arith.constant dense<0.000000e+00> : vector<8x32xf32>
    %236 = tpu.matmul %233, %235, %cst_100 {dimension_numbers = #tpu.dot_dimension_numbers<[1], [0], [0], [1], [0, 0, 1, 1], [], []>} : vector<8x8xf32>, vector<8x32xf32>, vector<8x32xf32> -> vector<8x32xf32>
    %237 = arith.addf %213, %236 : vector<8x32xf32>
    %238 = tpu.concatenate %133, %237 in 0 : vector<8x32xf32>, vector<8x32xf32> -> vector<16x32xf32>
    %c0_101 = arith.constant 0 : index
    %c0_102 = arith.constant 0 : index
    %239 = vector.load %arg8[%c0_101, %c0_102] : memref<1x32xf32, #tpu.memory_space<vmem>>, vector<1x32xf32>
    %240 = vector.broadcast %239 : vector<1x32xf32> to vector<16x32xf32>
    %241 = arith.addf %238, %240 : vector<16x32xf32>
    %242 = arith.addf %241, %1 : vector<16x32xf32>
    %cst_103 = arith.constant dense<0.000000e+00> : vector<16xf32>
    %243 = vector.multi_reduction <add>, %242, %cst_103 [1] : vector<16x32xf32> to vector<16xf32>
    %244 = vector.shape_cast %243 : vector<16xf32> to vector<16x1xf32>
    %cst_104 = arith.constant 3.200000e+01 : f32
    %245 = vector.broadcast %cst_104 : f32 to vector<16x1xf32>
    %246 = arith.divf %244, %245 : vector<16x1xf32>
    %247 = vector.broadcast %246 : vector<16x1xf32> to vector<16x32xf32>
    %248 = arith.subf %242, %247 : vector<16x32xf32>
    %249 = arith.mulf %248, %248 : vector<16x32xf32>
    %cst_105 = arith.constant dense<0.000000e+00> : vector<16xf32>
    %250 = vector.multi_reduction <add>, %249, %cst_105 [1] : vector<16x32xf32> to vector<16xf32>
    %251 = vector.shape_cast %250 : vector<16xf32> to vector<16x1xf32>
    %cst_106 = arith.constant 0.0322580636 : f32
    %252 = vector.broadcast %cst_106 : f32 to vector<16x1xf32>
    %253 = arith.mulf %251, %252 : vector<16x1xf32>
    %254 = vector.broadcast %246 : vector<16x1xf32> to vector<16x32xf32>
    %255 = arith.subf %242, %254 : vector<16x32xf32>
    %cst_107 = arith.constant 9.99999997E-7 : f32
    %256 = vector.broadcast %cst_107 : f32 to vector<16x1xf32>
    %257 = arith.addf %253, %256 : vector<16x1xf32>
    %258 = math.rsqrt %257 : vector<16x1xf32>
    %259 = vector.broadcast %258 : vector<16x1xf32> to vector<16x32xf32>
    %260 = arith.mulf %255, %259 : vector<16x32xf32>
    %c0_108 = arith.constant 0 : index
    %c0_109 = arith.constant 0 : index
    %261 = vector.load %arg9[%c0_108, %c0_109] : memref<32x32xf32, #tpu.memory_space<vmem>>, vector<32x32xf32>
    %cst_110 = arith.constant dense<0.000000e+00> : vector<16x32xf32>
    %262 = tpu.matmul %260, %261, %cst_110 {dimension_numbers = #tpu.dot_dimension_numbers<[1], [0], [0], [1], [0, 0, 1, 1], [], []>} : vector<16x32xf32>, vector<32x32xf32>, vector<16x32xf32> -> vector<16x32xf32>
    %c0_111 = arith.constant 0 : index
    %c0_112 = arith.constant 0 : index
    %263 = vector.load %arg10[%c0_111, %c0_112] : memref<1x32xf32, #tpu.memory_space<vmem>>, vector<1x32xf32>
    %264 = vector.broadcast %263 : vector<1x32xf32> to vector<16x32xf32>
    %265 = arith.addf %262, %264 : vector<16x32xf32>
    %c0_113 = arith.constant 0 : index
    %c0_114 = arith.constant 0 : index
    %266 = vector.load %arg11[%c0_113, %c0_114] : memref<32x64xf32, #tpu.memory_space<vmem>>, vector<32x64xf32>
    %cst_115 = arith.constant dense<0.000000e+00> : vector<16x64xf32>
    %267 = tpu.matmul %3, %266, %cst_115 {dimension_numbers = #tpu.dot_dimension_numbers<[1], [0], [0], [1], [0, 0, 1, 1], [], []>} : vector<16x32xf32>, vector<32x64xf32>, vector<16x64xf32> -> vector<16x64xf32>
    %c0_116 = arith.constant 0 : index
    %c0_117 = arith.constant 0 : index
    %268 = vector.load %arg12[%c0_116, %c0_117] : memref<1x64xf32, #tpu.memory_space<vmem>>, vector<1x64xf32>
    %269 = vector.broadcast %268 : vector<1x64xf32> to vector<16x64xf32>
    %270 = arith.addf %267, %269 : vector<16x64xf32>
    %271 = vector.extract_strided_slice %270 {offsets = [0, 0], sizes = [16, 32], strides = [1, 1]} : vector<16x64xf32> to vector<16x32xf32>
    %272 = vector.extract_strided_slice %270 {offsets = [0, 32], sizes = [16, 32], strides = [1, 1]} : vector<16x64xf32> to vector<16x32xf32>
    %273 = vector.extract_strided_slice %265 {offsets = [0, 0], sizes = [8, 32], strides = [1, 1]} : vector<16x32xf32> to vector<8x32xf32>
    %274 = vector.extract_strided_slice %271 {offsets = [0, 0], sizes = [8, 32], strides = [1, 1]} : vector<16x32xf32> to vector<8x32xf32>
    %275 = vector.extract_strided_slice %272 {offsets = [0, 0], sizes = [8, 32], strides = [1, 1]} : vector<16x32xf32> to vector<8x32xf32>
    %c0_118 = arith.constant 0 : index
    %c0_119 = arith.constant 0 : index
    %c0_120 = arith.constant 0 : index
    %276 = vector.load %arg4[%c0_118, %c0_119, %c0_120] : memref<2x8x8xf32, #tpu.memory_space<vmem>>, vector<1x8x8xf32>
    %277 = vector.shape_cast %276 : vector<1x8x8xf32> to vector<8x8xf32>
    %cst_121 = arith.constant 0.000000e+00 : f32
    %278 = vector.broadcast %cst_121 : f32 to vector<8x8xf32>
    %279 = arith.cmpf oeq, %277, %278 : vector<8x8xf32>
    %cst_122 = arith.constant 0.000000e+00 : f32
    %280 = vector.broadcast %cst_122 : f32 to vector<8x32xf32>
    %281 = vector.extract_strided_slice %273 {offsets = [0, 0], sizes = [8, 8], strides = [1, 1]} : vector<8x32xf32> to vector<8x8xf32>
    %282 = vector.extract_strided_slice %274 {offsets = [0, 0], sizes = [8, 8], strides = [1, 1]} : vector<8x32xf32> to vector<8x8xf32>
    %283 = vector.extract_strided_slice %275 {offsets = [0, 0], sizes = [8, 8], strides = [1, 1]} : vector<8x32xf32> to vector<8x8xf32>
    %284 = tpu.transpose %282, [1, 0] : vector<8x8xf32> -> vector<8x8xf32>
    %cst_123 = arith.constant dense<0.000000e+00> : vector<8x8xf32>
    %285 = tpu.matmul %281, %284, %cst_123 {dimension_numbers = #tpu.dot_dimension_numbers<[1], [0], [0], [1], [0, 0, 1, 1], [], []>} : vector<8x8xf32>, vector<8x8xf32>, vector<8x8xf32> -> vector<8x8xf32>
    %cst_124 = arith.constant 0.353553385 : f32
    %286 = vector.broadcast %cst_124 : f32 to vector<8x8xf32>
    %287 = arith.mulf %285, %286 : vector<8x8xf32>
    %cst_125 = arith.constant -1.000000e+09 : f32
    %288 = vector.broadcast %cst_125 : f32 to vector<8x8xf32>
    %289 = arith.select %279, %288, %287 : vector<8x8xi1>, vector<8x8xf32>
    %cst_126 = arith.constant dense<0xFF800000> : vector<8xf32>
    %290 = vector.multi_reduction <maximumf>, %289, %cst_126 [1] : vector<8x8xf32> to vector<8xf32>
    %291 = vector.shape_cast %290 : vector<8xf32> to vector<8x1xf32>
    %292 = vector.broadcast %291 : vector<8x1xf32> to vector<8x8xf32>
    %293 = arith.subf %289, %292 : vector<8x8xf32>
    %294 = math.exp %293 : vector<8x8xf32>
    %cst_127 = arith.constant dense<0.000000e+00> : vector<8xf32>
    %295 = vector.multi_reduction <add>, %294, %cst_127 [1] : vector<8x8xf32> to vector<8xf32>
    %296 = vector.shape_cast %295 : vector<8xf32> to vector<8x1xf32>
    %297 = tpu.reciprocal %296 : vector<8x1xf32> -> vector<8x1xf32>
    %298 = vector.broadcast %297 : vector<8x1xf32> to vector<8x8xf32>
    %299 = arith.mulf %294, %298 : vector<8x8xf32>
    %cst_128 = arith.constant dense<0.000000e+00> : vector<8x8xf32>
    %300 = tpu.matmul %299, %283, %cst_128 {dimension_numbers = #tpu.dot_dimension_numbers<[1], [0], [0], [1], [0, 0, 1, 1], [], []>} : vector<8x8xf32>, vector<8x8xf32>, vector<8x8xf32> -> vector<8x8xf32>
    %c0_129 = arith.constant 0 : index
    %c0_130 = arith.constant 0 : index
    %c0_131 = arith.constant 0 : index
    %301 = vector.load %arg13[%c0_129, %c0_130, %c0_131] : memref<4x8x32xf32, #tpu.memory_space<vmem>>, vector<1x8x32xf32>
    %302 = vector.shape_cast %301 : vector<1x8x32xf32> to vector<8x32xf32>
    %cst_132 = arith.constant dense<0.000000e+00> : vector<8x32xf32>
    %303 = tpu.matmul %300, %302, %cst_132 {dimension_numbers = #tpu.dot_dimension_numbers<[1], [0], [0], [1], [0, 0, 1, 1], [], []>} : vector<8x8xf32>, vector<8x32xf32>, vector<8x32xf32> -> vector<8x32xf32>
    %304 = arith.addf %280, %303 : vector<8x32xf32>
    %305 = vector.extract_strided_slice %273 {offsets = [0, 8], sizes = [8, 8], strides = [1, 1]} : vector<8x32xf32> to vector<8x8xf32>
    %306 = vector.extract_strided_slice %274 {offsets = [0, 8], sizes = [8, 8], strides = [1, 1]} : vector<8x32xf32> to vector<8x8xf32>
    %307 = vector.extract_strided_slice %275 {offsets = [0, 8], sizes = [8, 8], strides = [1, 1]} : vector<8x32xf32> to vector<8x8xf32>
    %308 = tpu.transpose %306, [1, 0] : vector<8x8xf32> -> vector<8x8xf32>
    %cst_133 = arith.constant dense<0.000000e+00> : vector<8x8xf32>
    %309 = tpu.matmul %305, %308, %cst_133 {dimension_numbers = #tpu.dot_dimension_numbers<[1], [0], [0], [1], [0, 0, 1, 1], [], []>} : vector<8x8xf32>, vector<8x8xf32>, vector<8x8xf32> -> vector<8x8xf32>
    %cst_134 = arith.constant 0.353553385 : f32
    %310 = vector.broadcast %cst_134 : f32 to vector<8x8xf32>
    %311 = arith.mulf %309, %310 : vector<8x8xf32>
    %cst_135 = arith.constant -1.000000e+09 : f32
    %312 = vector.broadcast %cst_135 : f32 to vector<8x8xf32>
    %313 = arith.select %279, %312, %311 : vector<8x8xi1>, vector<8x8xf32>
    %cst_136 = arith.constant dense<0xFF800000> : vector<8xf32>
    %314 = vector.multi_reduction <maximumf>, %313, %cst_136 [1] : vector<8x8xf32> to vector<8xf32>
    %315 = vector.shape_cast %314 : vector<8xf32> to vector<8x1xf32>
    %316 = vector.broadcast %315 : vector<8x1xf32> to vector<8x8xf32>
    %317 = arith.subf %313, %316 : vector<8x8xf32>
    %318 = math.exp %317 : vector<8x8xf32>
    %cst_137 = arith.constant dense<0.000000e+00> : vector<8xf32>
    %319 = vector.multi_reduction <add>, %318, %cst_137 [1] : vector<8x8xf32> to vector<8xf32>
    %320 = vector.shape_cast %319 : vector<8xf32> to vector<8x1xf32>
    %321 = tpu.reciprocal %320 : vector<8x1xf32> -> vector<8x1xf32>
    %322 = vector.broadcast %321 : vector<8x1xf32> to vector<8x8xf32>
    %323 = arith.mulf %318, %322 : vector<8x8xf32>
    %cst_138 = arith.constant dense<0.000000e+00> : vector<8x8xf32>
    %324 = tpu.matmul %323, %307, %cst_138 {dimension_numbers = #tpu.dot_dimension_numbers<[1], [0], [0], [1], [0, 0, 1, 1], [], []>} : vector<8x8xf32>, vector<8x8xf32>, vector<8x8xf32> -> vector<8x8xf32>
    %c1_139 = arith.constant 1 : index
    %c0_140 = arith.constant 0 : index
    %c0_141 = arith.constant 0 : index
    %325 = vector.load %arg13[%c1_139, %c0_140, %c0_141] : memref<4x8x32xf32, #tpu.memory_space<vmem>>, vector<1x8x32xf32>
    %326 = vector.shape_cast %325 : vector<1x8x32xf32> to vector<8x32xf32>
    %cst_142 = arith.constant dense<0.000000e+00> : vector<8x32xf32>
    %327 = tpu.matmul %324, %326, %cst_142 {dimension_numbers = #tpu.dot_dimension_numbers<[1], [0], [0], [1], [0, 0, 1, 1], [], []>} : vector<8x8xf32>, vector<8x32xf32>, vector<8x32xf32> -> vector<8x32xf32>
    %328 = arith.addf %304, %327 : vector<8x32xf32>
    %329 = vector.extract_strided_slice %273 {offsets = [0, 16], sizes = [8, 8], strides = [1, 1]} : vector<8x32xf32> to vector<8x8xf32>
    %330 = vector.extract_strided_slice %274 {offsets = [0, 16], sizes = [8, 8], strides = [1, 1]} : vector<8x32xf32> to vector<8x8xf32>
    %331 = vector.extract_strided_slice %275 {offsets = [0, 16], sizes = [8, 8], strides = [1, 1]} : vector<8x32xf32> to vector<8x8xf32>
    %332 = tpu.transpose %330, [1, 0] : vector<8x8xf32> -> vector<8x8xf32>
    %cst_143 = arith.constant dense<0.000000e+00> : vector<8x8xf32>
    %333 = tpu.matmul %329, %332, %cst_143 {dimension_numbers = #tpu.dot_dimension_numbers<[1], [0], [0], [1], [0, 0, 1, 1], [], []>} : vector<8x8xf32>, vector<8x8xf32>, vector<8x8xf32> -> vector<8x8xf32>
    %cst_144 = arith.constant 0.353553385 : f32
    %334 = vector.broadcast %cst_144 : f32 to vector<8x8xf32>
    %335 = arith.mulf %333, %334 : vector<8x8xf32>
    %cst_145 = arith.constant -1.000000e+09 : f32
    %336 = vector.broadcast %cst_145 : f32 to vector<8x8xf32>
    %337 = arith.select %279, %336, %335 : vector<8x8xi1>, vector<8x8xf32>
    %cst_146 = arith.constant dense<0xFF800000> : vector<8xf32>
    %338 = vector.multi_reduction <maximumf>, %337, %cst_146 [1] : vector<8x8xf32> to vector<8xf32>
    %339 = vector.shape_cast %338 : vector<8xf32> to vector<8x1xf32>
    %340 = vector.broadcast %339 : vector<8x1xf32> to vector<8x8xf32>
    %341 = arith.subf %337, %340 : vector<8x8xf32>
    %342 = math.exp %341 : vector<8x8xf32>
    %cst_147 = arith.constant dense<0.000000e+00> : vector<8xf32>
    %343 = vector.multi_reduction <add>, %342, %cst_147 [1] : vector<8x8xf32> to vector<8xf32>
    %344 = vector.shape_cast %343 : vector<8xf32> to vector<8x1xf32>
    %345 = tpu.reciprocal %344 : vector<8x1xf32> -> vector<8x1xf32>
    %346 = vector.broadcast %345 : vector<8x1xf32> to vector<8x8xf32>
    %347 = arith.mulf %342, %346 : vector<8x8xf32>
    %cst_148 = arith.constant dense<0.000000e+00> : vector<8x8xf32>
    %348 = tpu.matmul %347, %331, %cst_148 {dimension_numbers = #tpu.dot_dimension_numbers<[1], [0], [0], [1], [0, 0, 1, 1], [], []>} : vector<8x8xf32>, vector<8x8xf32>, vector<8x8xf32> -> vector<8x8xf32>
    %c2_149 = arith.constant 2 : index
    %c0_150 = arith.constant 0 : index
    %c0_151 = arith.constant 0 : index
    %349 = vector.load %arg13[%c2_149, %c0_150, %c0_151] : memref<4x8x32xf32, #tpu.memory_space<vmem>>, vector<1x8x32xf32>
    %350 = vector.shape_cast %349 : vector<1x8x32xf32> to vector<8x32xf32>
    %cst_152 = arith.constant dense<0.000000e+00> : vector<8x32xf32>
    %351 = tpu.matmul %348, %350, %cst_152 {dimension_numbers = #tpu.dot_dimension_numbers<[1], [0], [0], [1], [0, 0, 1, 1], [], []>} : vector<8x8xf32>, vector<8x32xf32>, vector<8x32xf32> -> vector<8x32xf32>
    %352 = arith.addf %328, %351 : vector<8x32xf32>
    %353 = vector.extract_strided_slice %273 {offsets = [0, 24], sizes = [8, 8], strides = [1, 1]} : vector<8x32xf32> to vector<8x8xf32>
    %354 = vector.extract_strided_slice %274 {offsets = [0, 24], sizes = [8, 8], strides = [1, 1]} : vector<8x32xf32> to vector<8x8xf32>
    %355 = vector.extract_strided_slice %275 {offsets = [0, 24], sizes = [8, 8], strides = [1, 1]} : vector<8x32xf32> to vector<8x8xf32>
    %356 = tpu.transpose %354, [1, 0] : vector<8x8xf32> -> vector<8x8xf32>
    %cst_153 = arith.constant dense<0.000000e+00> : vector<8x8xf32>
    %357 = tpu.matmul %353, %356, %cst_153 {dimension_numbers = #tpu.dot_dimension_numbers<[1], [0], [0], [1], [0, 0, 1, 1], [], []>} : vector<8x8xf32>, vector<8x8xf32>, vector<8x8xf32> -> vector<8x8xf32>
    %cst_154 = arith.constant 0.353553385 : f32
    %358 = vector.broadcast %cst_154 : f32 to vector<8x8xf32>
    %359 = arith.mulf %357, %358 : vector<8x8xf32>
    %cst_155 = arith.constant -1.000000e+09 : f32
    %360 = vector.broadcast %cst_155 : f32 to vector<8x8xf32>
    %361 = arith.select %279, %360, %359 : vector<8x8xi1>, vector<8x8xf32>
    %cst_156 = arith.constant dense<0xFF800000> : vector<8xf32>
    %362 = vector.multi_reduction <maximumf>, %361, %cst_156 [1] : vector<8x8xf32> to vector<8xf32>
    %363 = vector.shape_cast %362 : vector<8xf32> to vector<8x1xf32>
    %364 = vector.broadcast %363 : vector<8x1xf32> to vector<8x8xf32>
    %365 = arith.subf %361, %364 : vector<8x8xf32>
    %366 = math.exp %365 : vector<8x8xf32>
    %cst_157 = arith.constant dense<0.000000e+00> : vector<8xf32>
    %367 = vector.multi_reduction <add>, %366, %cst_157 [1] : vector<8x8xf32> to vector<8xf32>
    %368 = vector.shape_cast %367 : vector<8xf32> to vector<8x1xf32>
    %369 = tpu.reciprocal %368 : vector<8x1xf32> -> vector<8x1xf32>
    %370 = vector.broadcast %369 : vector<8x1xf32> to vector<8x8xf32>
    %371 = arith.mulf %366, %370 : vector<8x8xf32>
    %cst_158 = arith.constant dense<0.000000e+00> : vector<8x8xf32>
    %372 = tpu.matmul %371, %355, %cst_158 {dimension_numbers = #tpu.dot_dimension_numbers<[1], [0], [0], [1], [0, 0, 1, 1], [], []>} : vector<8x8xf32>, vector<8x8xf32>, vector<8x8xf32> -> vector<8x8xf32>
    %c3_159 = arith.constant 3 : index
    %c0_160 = arith.constant 0 : index
    %c0_161 = arith.constant 0 : index
    %373 = vector.load %arg13[%c3_159, %c0_160, %c0_161] : memref<4x8x32xf32, #tpu.memory_space<vmem>>, vector<1x8x32xf32>
    %374 = vector.shape_cast %373 : vector<1x8x32xf32> to vector<8x32xf32>
    %cst_162 = arith.constant dense<0.000000e+00> : vector<8x32xf32>
    %375 = tpu.matmul %372, %374, %cst_162 {dimension_numbers = #tpu.dot_dimension_numbers<[1], [0], [0], [1], [0, 0, 1, 1], [], []>} : vector<8x8xf32>, vector<8x32xf32>, vector<8x32xf32> -> vector<8x32xf32>
    %376 = arith.addf %352, %375 : vector<8x32xf32>
    %377 = vector.extract_strided_slice %265 {offsets = [8, 0], sizes = [8, 32], strides = [1, 1]} : vector<16x32xf32> to vector<8x32xf32>
    %378 = vector.extract_strided_slice %271 {offsets = [8, 0], sizes = [8, 32], strides = [1, 1]} : vector<16x32xf32> to vector<8x32xf32>
    %379 = vector.extract_strided_slice %272 {offsets = [8, 0], sizes = [8, 32], strides = [1, 1]} : vector<16x32xf32> to vector<8x32xf32>
    %c1_163 = arith.constant 1 : index
    %c0_164 = arith.constant 0 : index
    %c0_165 = arith.constant 0 : index
    %380 = vector.load %arg4[%c1_163, %c0_164, %c0_165] : memref<2x8x8xf32, #tpu.memory_space<vmem>>, vector<1x8x8xf32>
    %381 = vector.shape_cast %380 : vector<1x8x8xf32> to vector<8x8xf32>
    %cst_166 = arith.constant 0.000000e+00 : f32
    %382 = vector.broadcast %cst_166 : f32 to vector<8x8xf32>
    %383 = arith.cmpf oeq, %381, %382 : vector<8x8xf32>
    %cst_167 = arith.constant 0.000000e+00 : f32
    %384 = vector.broadcast %cst_167 : f32 to vector<8x32xf32>
    %385 = vector.extract_strided_slice %377 {offsets = [0, 0], sizes = [8, 8], strides = [1, 1]} : vector<8x32xf32> to vector<8x8xf32>
    %386 = vector.extract_strided_slice %378 {offsets = [0, 0], sizes = [8, 8], strides = [1, 1]} : vector<8x32xf32> to vector<8x8xf32>
    %387 = vector.extract_strided_slice %379 {offsets = [0, 0], sizes = [8, 8], strides = [1, 1]} : vector<8x32xf32> to vector<8x8xf32>
    %388 = tpu.transpose %386, [1, 0] : vector<8x8xf32> -> vector<8x8xf32>
    %cst_168 = arith.constant dense<0.000000e+00> : vector<8x8xf32>
    %389 = tpu.matmul %385, %388, %cst_168 {dimension_numbers = #tpu.dot_dimension_numbers<[1], [0], [0], [1], [0, 0, 1, 1], [], []>} : vector<8x8xf32>, vector<8x8xf32>, vector<8x8xf32> -> vector<8x8xf32>
    %cst_169 = arith.constant 0.353553385 : f32
    %390 = vector.broadcast %cst_169 : f32 to vector<8x8xf32>
    %391 = arith.mulf %389, %390 : vector<8x8xf32>
    %cst_170 = arith.constant -1.000000e+09 : f32
    %392 = vector.broadcast %cst_170 : f32 to vector<8x8xf32>
    %393 = arith.select %383, %392, %391 : vector<8x8xi1>, vector<8x8xf32>
    %cst_171 = arith.constant dense<0xFF800000> : vector<8xf32>
    %394 = vector.multi_reduction <maximumf>, %393, %cst_171 [1] : vector<8x8xf32> to vector<8xf32>
    %395 = vector.shape_cast %394 : vector<8xf32> to vector<8x1xf32>
    %396 = vector.broadcast %395 : vector<8x1xf32> to vector<8x8xf32>
    %397 = arith.subf %393, %396 : vector<8x8xf32>
    %398 = math.exp %397 : vector<8x8xf32>
    %cst_172 = arith.constant dense<0.000000e+00> : vector<8xf32>
    %399 = vector.multi_reduction <add>, %398, %cst_172 [1] : vector<8x8xf32> to vector<8xf32>
    %400 = vector.shape_cast %399 : vector<8xf32> to vector<8x1xf32>
    %401 = tpu.reciprocal %400 : vector<8x1xf32> -> vector<8x1xf32>
    %402 = vector.broadcast %401 : vector<8x1xf32> to vector<8x8xf32>
    %403 = arith.mulf %398, %402 : vector<8x8xf32>
    %cst_173 = arith.constant dense<0.000000e+00> : vector<8x8xf32>
    %404 = tpu.matmul %403, %387, %cst_173 {dimension_numbers = #tpu.dot_dimension_numbers<[1], [0], [0], [1], [0, 0, 1, 1], [], []>} : vector<8x8xf32>, vector<8x8xf32>, vector<8x8xf32> -> vector<8x8xf32>
    %c0_174 = arith.constant 0 : index
    %c0_175 = arith.constant 0 : index
    %c0_176 = arith.constant 0 : index
    %405 = vector.load %arg13[%c0_174, %c0_175, %c0_176] : memref<4x8x32xf32, #tpu.memory_space<vmem>>, vector<1x8x32xf32>
    %406 = vector.shape_cast %405 : vector<1x8x32xf32> to vector<8x32xf32>
    %cst_177 = arith.constant dense<0.000000e+00> : vector<8x32xf32>
    %407 = tpu.matmul %404, %406, %cst_177 {dimension_numbers = #tpu.dot_dimension_numbers<[1], [0], [0], [1], [0, 0, 1, 1], [], []>} : vector<8x8xf32>, vector<8x32xf32>, vector<8x32xf32> -> vector<8x32xf32>
    %408 = arith.addf %384, %407 : vector<8x32xf32>
    %409 = vector.extract_strided_slice %377 {offsets = [0, 8], sizes = [8, 8], strides = [1, 1]} : vector<8x32xf32> to vector<8x8xf32>
    %410 = vector.extract_strided_slice %378 {offsets = [0, 8], sizes = [8, 8], strides = [1, 1]} : vector<8x32xf32> to vector<8x8xf32>
    %411 = vector.extract_strided_slice %379 {offsets = [0, 8], sizes = [8, 8], strides = [1, 1]} : vector<8x32xf32> to vector<8x8xf32>
    %412 = tpu.transpose %410, [1, 0] : vector<8x8xf32> -> vector<8x8xf32>
    %cst_178 = arith.constant dense<0.000000e+00> : vector<8x8xf32>
    %413 = tpu.matmul %409, %412, %cst_178 {dimension_numbers = #tpu.dot_dimension_numbers<[1], [0], [0], [1], [0, 0, 1, 1], [], []>} : vector<8x8xf32>, vector<8x8xf32>, vector<8x8xf32> -> vector<8x8xf32>
    %cst_179 = arith.constant 0.353553385 : f32
    %414 = vector.broadcast %cst_179 : f32 to vector<8x8xf32>
    %415 = arith.mulf %413, %414 : vector<8x8xf32>
    %cst_180 = arith.constant -1.000000e+09 : f32
    %416 = vector.broadcast %cst_180 : f32 to vector<8x8xf32>
    %417 = arith.select %383, %416, %415 : vector<8x8xi1>, vector<8x8xf32>
    %cst_181 = arith.constant dense<0xFF800000> : vector<8xf32>
    %418 = vector.multi_reduction <maximumf>, %417, %cst_181 [1] : vector<8x8xf32> to vector<8xf32>
    %419 = vector.shape_cast %418 : vector<8xf32> to vector<8x1xf32>
    %420 = vector.broadcast %419 : vector<8x1xf32> to vector<8x8xf32>
    %421 = arith.subf %417, %420 : vector<8x8xf32>
    %422 = math.exp %421 : vector<8x8xf32>
    %cst_182 = arith.constant dense<0.000000e+00> : vector<8xf32>
    %423 = vector.multi_reduction <add>, %422, %cst_182 [1] : vector<8x8xf32> to vector<8xf32>
    %424 = vector.shape_cast %423 : vector<8xf32> to vector<8x1xf32>
    %425 = tpu.reciprocal %424 : vector<8x1xf32> -> vector<8x1xf32>
    %426 = vector.broadcast %425 : vector<8x1xf32> to vector<8x8xf32>
    %427 = arith.mulf %422, %426 : vector<8x8xf32>
    %cst_183 = arith.constant dense<0.000000e+00> : vector<8x8xf32>
    %428 = tpu.matmul %427, %411, %cst_183 {dimension_numbers = #tpu.dot_dimension_numbers<[1], [0], [0], [1], [0, 0, 1, 1], [], []>} : vector<8x8xf32>, vector<8x8xf32>, vector<8x8xf32> -> vector<8x8xf32>
    %c1_184 = arith.constant 1 : index
    %c0_185 = arith.constant 0 : index
    %c0_186 = arith.constant 0 : index
    %429 = vector.load %arg13[%c1_184, %c0_185, %c0_186] : memref<4x8x32xf32, #tpu.memory_space<vmem>>, vector<1x8x32xf32>
    %430 = vector.shape_cast %429 : vector<1x8x32xf32> to vector<8x32xf32>
    %cst_187 = arith.constant dense<0.000000e+00> : vector<8x32xf32>
    %431 = tpu.matmul %428, %430, %cst_187 {dimension_numbers = #tpu.dot_dimension_numbers<[1], [0], [0], [1], [0, 0, 1, 1], [], []>} : vector<8x8xf32>, vector<8x32xf32>, vector<8x32xf32> -> vector<8x32xf32>
    %432 = arith.addf %408, %431 : vector<8x32xf32>
    %433 = vector.extract_strided_slice %377 {offsets = [0, 16], sizes = [8, 8], strides = [1, 1]} : vector<8x32xf32> to vector<8x8xf32>
    %434 = vector.extract_strided_slice %378 {offsets = [0, 16], sizes = [8, 8], strides = [1, 1]} : vector<8x32xf32> to vector<8x8xf32>
    %435 = vector.extract_strided_slice %379 {offsets = [0, 16], sizes = [8, 8], strides = [1, 1]} : vector<8x32xf32> to vector<8x8xf32>
    %436 = tpu.transpose %434, [1, 0] : vector<8x8xf32> -> vector<8x8xf32>
    %cst_188 = arith.constant dense<0.000000e+00> : vector<8x8xf32>
    %437 = tpu.matmul %433, %436, %cst_188 {dimension_numbers = #tpu.dot_dimension_numbers<[1], [0], [0], [1], [0, 0, 1, 1], [], []>} : vector<8x8xf32>, vector<8x8xf32>, vector<8x8xf32> -> vector<8x8xf32>
    %cst_189 = arith.constant 0.353553385 : f32
    %438 = vector.broadcast %cst_189 : f32 to vector<8x8xf32>
    %439 = arith.mulf %437, %438 : vector<8x8xf32>
    %cst_190 = arith.constant -1.000000e+09 : f32
    %440 = vector.broadcast %cst_190 : f32 to vector<8x8xf32>
    %441 = arith.select %383, %440, %439 : vector<8x8xi1>, vector<8x8xf32>
    %cst_191 = arith.constant dense<0xFF800000> : vector<8xf32>
    %442 = vector.multi_reduction <maximumf>, %441, %cst_191 [1] : vector<8x8xf32> to vector<8xf32>
    %443 = vector.shape_cast %442 : vector<8xf32> to vector<8x1xf32>
    %444 = vector.broadcast %443 : vector<8x1xf32> to vector<8x8xf32>
    %445 = arith.subf %441, %444 : vector<8x8xf32>
    %446 = math.exp %445 : vector<8x8xf32>
    %cst_192 = arith.constant dense<0.000000e+00> : vector<8xf32>
    %447 = vector.multi_reduction <add>, %446, %cst_192 [1] : vector<8x8xf32> to vector<8xf32>
    %448 = vector.shape_cast %447 : vector<8xf32> to vector<8x1xf32>
    %449 = tpu.reciprocal %448 : vector<8x1xf32> -> vector<8x1xf32>
    %450 = vector.broadcast %449 : vector<8x1xf32> to vector<8x8xf32>
    %451 = arith.mulf %446, %450 : vector<8x8xf32>
    %cst_193 = arith.constant dense<0.000000e+00> : vector<8x8xf32>
    %452 = tpu.matmul %451, %435, %cst_193 {dimension_numbers = #tpu.dot_dimension_numbers<[1], [0], [0], [1], [0, 0, 1, 1], [], []>} : vector<8x8xf32>, vector<8x8xf32>, vector<8x8xf32> -> vector<8x8xf32>
    %c2_194 = arith.constant 2 : index
    %c0_195 = arith.constant 0 : index
    %c0_196 = arith.constant 0 : index
    %453 = vector.load %arg13[%c2_194, %c0_195, %c0_196] : memref<4x8x32xf32, #tpu.memory_space<vmem>>, vector<1x8x32xf32>
    %454 = vector.shape_cast %453 : vector<1x8x32xf32> to vector<8x32xf32>
    %cst_197 = arith.constant dense<0.000000e+00> : vector<8x32xf32>
    %455 = tpu.matmul %452, %454, %cst_197 {dimension_numbers = #tpu.dot_dimension_numbers<[1], [0], [0], [1], [0, 0, 1, 1], [], []>} : vector<8x8xf32>, vector<8x32xf32>, vector<8x32xf32> -> vector<8x32xf32>
    %456 = arith.addf %432, %455 : vector<8x32xf32>
    %457 = vector.extract_strided_slice %377 {offsets = [0, 24], sizes = [8, 8], strides = [1, 1]} : vector<8x32xf32> to vector<8x8xf32>
    %458 = vector.extract_strided_slice %378 {offsets = [0, 24], sizes = [8, 8], strides = [1, 1]} : vector<8x32xf32> to vector<8x8xf32>
    %459 = vector.extract_strided_slice %379 {offsets = [0, 24], sizes = [8, 8], strides = [1, 1]} : vector<8x32xf32> to vector<8x8xf32>
    %460 = tpu.transpose %458, [1, 0] : vector<8x8xf32> -> vector<8x8xf32>
    %cst_198 = arith.constant dense<0.000000e+00> : vector<8x8xf32>
    %461 = tpu.matmul %457, %460, %cst_198 {dimension_numbers = #tpu.dot_dimension_numbers<[1], [0], [0], [1], [0, 0, 1, 1], [], []>} : vector<8x8xf32>, vector<8x8xf32>, vector<8x8xf32> -> vector<8x8xf32>
    %cst_199 = arith.constant 0.353553385 : f32
    %462 = vector.broadcast %cst_199 : f32 to vector<8x8xf32>
    %463 = arith.mulf %461, %462 : vector<8x8xf32>
    %cst_200 = arith.constant -1.000000e+09 : f32
    %464 = vector.broadcast %cst_200 : f32 to vector<8x8xf32>
    %465 = arith.select %383, %464, %463 : vector<8x8xi1>, vector<8x8xf32>
    %cst_201 = arith.constant dense<0xFF800000> : vector<8xf32>
    %466 = vector.multi_reduction <maximumf>, %465, %cst_201 [1] : vector<8x8xf32> to vector<8xf32>
    %467 = vector.shape_cast %466 : vector<8xf32> to vector<8x1xf32>
    %468 = vector.broadcast %467 : vector<8x1xf32> to vector<8x8xf32>
    %469 = arith.subf %465, %468 : vector<8x8xf32>
    %470 = math.exp %469 : vector<8x8xf32>
    %cst_202 = arith.constant dense<0.000000e+00> : vector<8xf32>
    %471 = vector.multi_reduction <add>, %470, %cst_202 [1] : vector<8x8xf32> to vector<8xf32>
    %472 = vector.shape_cast %471 : vector<8xf32> to vector<8x1xf32>
    %473 = tpu.reciprocal %472 : vector<8x1xf32> -> vector<8x1xf32>
    %474 = vector.broadcast %473 : vector<8x1xf32> to vector<8x8xf32>
    %475 = arith.mulf %470, %474 : vector<8x8xf32>
    %cst_203 = arith.constant dense<0.000000e+00> : vector<8x8xf32>
    %476 = tpu.matmul %475, %459, %cst_203 {dimension_numbers = #tpu.dot_dimension_numbers<[1], [0], [0], [1], [0, 0, 1, 1], [], []>} : vector<8x8xf32>, vector<8x8xf32>, vector<8x8xf32> -> vector<8x8xf32>
    %c3_204 = arith.constant 3 : index
    %c0_205 = arith.constant 0 : index
    %c0_206 = arith.constant 0 : index
    %477 = vector.load %arg13[%c3_204, %c0_205, %c0_206] : memref<4x8x32xf32, #tpu.memory_space<vmem>>, vector<1x8x32xf32>
    %478 = vector.shape_cast %477 : vector<1x8x32xf32> to vector<8x32xf32>
    %cst_207 = arith.constant dense<0.000000e+00> : vector<8x32xf32>
    %479 = tpu.matmul %476, %478, %cst_207 {dimension_numbers = #tpu.dot_dimension_numbers<[1], [0], [0], [1], [0, 0, 1, 1], [], []>} : vector<8x8xf32>, vector<8x32xf32>, vector<8x32xf32> -> vector<8x32xf32>
    %480 = arith.addf %456, %479 : vector<8x32xf32>
    %481 = tpu.concatenate %376, %480 in 0 : vector<8x32xf32>, vector<8x32xf32> -> vector<16x32xf32>
    %c0_208 = arith.constant 0 : index
    %c0_209 = arith.constant 0 : index
    %482 = vector.load %arg14[%c0_208, %c0_209] : memref<1x32xf32, #tpu.memory_space<vmem>>, vector<1x32xf32>
    %483 = vector.broadcast %482 : vector<1x32xf32> to vector<16x32xf32>
    %484 = arith.addf %481, %483 : vector<16x32xf32>
    %485 = arith.addf %242, %484 : vector<16x32xf32>
    %c0_210 = arith.constant 0 : index
    %c0_211 = arith.constant 0 : index
    %486 = vector.load %arg15[%c0_210, %c0_211] : memref<32x64xf32, #tpu.memory_space<vmem>>, vector<32x64xf32>
    %cst_212 = arith.constant dense<0.000000e+00> : vector<16x64xf32>
    %487 = tpu.matmul %485, %486, %cst_212 {dimension_numbers = #tpu.dot_dimension_numbers<[1], [0], [0], [1], [0, 0, 1, 1], [], []>} : vector<16x32xf32>, vector<32x64xf32>, vector<16x64xf32> -> vector<16x64xf32>
    %c0_213 = arith.constant 0 : index
    %c0_214 = arith.constant 0 : index
    %488 = vector.load %arg16[%c0_213, %c0_214] : memref<1x64xf32, #tpu.memory_space<vmem>>, vector<1x64xf32>
    %489 = vector.broadcast %488 : vector<1x64xf32> to vector<16x64xf32>
    %490 = arith.addf %487, %489 : vector<16x64xf32>
    %cst_215 = arith.constant 0.000000e+00 : f32
    %491 = vector.broadcast %cst_215 : f32 to vector<16x64xf32>
    %492 = arith.maximumf %490, %491 : vector<16x64xf32>
    %c0_216 = arith.constant 0 : index
    %c0_217 = arith.constant 0 : index
    %493 = vector.load %arg17[%c0_216, %c0_217] : memref<64x32xf32, #tpu.memory_space<vmem>>, vector<64x32xf32>
    %cst_218 = arith.constant dense<0.000000e+00> : vector<16x32xf32>
    %494 = tpu.matmul %492, %493, %cst_218 {dimension_numbers = #tpu.dot_dimension_numbers<[1], [0], [0], [1], [0, 0, 1, 1], [], []>} : vector<16x64xf32>, vector<64x32xf32>, vector<16x32xf32> -> vector<16x32xf32>
    %c0_219 = arith.constant 0 : index
    %c0_220 = arith.constant 0 : index
    %495 = vector.load %arg18[%c0_219, %c0_220] : memref<1x32xf32, #tpu.memory_space<vmem>>, vector<1x32xf32>
    %496 = vector.broadcast %495 : vector<1x32xf32> to vector<16x32xf32>
    %497 = arith.addf %494, %496 : vector<16x32xf32>
    %498 = arith.addf %497, %485 : vector<16x32xf32>
    %499 = vector.shape_cast %498 : vector<16x32xf32> to vector<2x8x32xf32>
    %c0_221 = arith.constant 0 : index
    %c0_222 = arith.constant 0 : index
    %c0_223 = arith.constant 0 : index
    %500 = vector.load %arg19[%c0_221, %c0_222, %c0_223] : memref<2x8x32xf32, #tpu.memory_space<vmem>>, vector<2x8x32xf32>
    tpu.vector_store %arg19[%c0_221, %c0_222, %c0_223], %499 {strides = array<i32>} : memref<2x8x32xf32, #tpu.memory_space<vmem>>, vector<2x8x32xf32>,
    return
  }
  func.func @transform_0(%arg0: i32) -> (i32, i32, i32) {
    %c0_i32 = arith.constant 0 : i32
    %c0_i32_0 = arith.constant 0 : i32
    %c0_i32_1 = arith.constant 0 : i32
    return %arg0, %c0_i32, %c0_i32_0 : i32, i32, i32
  }
  func.func @transform_1(%arg0: i32) -> (i32, i32, i32) {
    %c0_i32 = arith.constant 0 : i32
    %c0_i32_0 = arith.constant 0 : i32
    %c0_i32_1 = arith.constant 0 : i32
    return %arg0, %c0_i32, %c0_i32_0 : i32, i32, i32
  }
  func.func @transform_2(%arg0: i32) -> (i32, i32, i32) {
    %c0_i32 = arith.constant 0 : i32
    %c0_i32_0 = arith.constant 0 : i32
    %c0_i32_1 = arith.constant 0 : i32
    return %arg0, %c0_i32, %c0_i32_0 : i32, i32, i32
  }
  func.func @transform_3(%arg0: i32) -> (i32, i32, i32) {
    %c0_i32 = arith.constant 0 : i32
    %c0_i32_0 = arith.constant 0 : i32
    %c0_i32_1 = arith.constant 0 : i32
    return %arg0, %c0_i32, %c0_i32_0 : i32, i32, i32
  }
  func.func @transform_4(%arg0: i32) -> (i32, i32) {
    %c0_i32 = arith.constant 0 : i32
    %c0_i32_0 = arith.constant 0 : i32
    %c0_i32_1 = arith.constant 0 : i32
    return %c0_i32, %c0_i32_0 : i32, i32
  }
  func.func @transform_5(%arg0: i32) -> (i32, i32) {
    %c0_i32 = arith.constant 0 : i32
    %c0_i32_0 = arith.constant 0 : i32
    %c0_i32_1 = arith.constant 0 : i32
    return %c0_i32, %c0_i32_0 : i32, i32
  }
  func.func @transform_6(%arg0: i32) -> (i32, i32, i32) {
    %c0_i32 = arith.constant 0 : i32
    %c0_i32_0 = arith.constant 0 : i32
    %c0_i32_1 = arith.constant 0 : i32
    %c0_i32_2 = arith.constant 0 : i32
    return %c0_i32, %c0_i32_0, %c0_i32_1 : i32, i32, i32
  }
  func.func @transform_7(%arg0: i32) -> (i32, i32) {
    %c0_i32 = arith.constant 0 : i32
    %c0_i32_0 = arith.constant 0 : i32
    %c0_i32_1 = arith.constant 0 : i32
    return %c0_i32, %c0_i32_0 : i32, i32
  }
  func.func @transform_8(%arg0: i32) -> (i32, i32) {
    %c0_i32 = arith.constant 0 : i32
    %c0_i32_0 = arith.constant 0 : i32
    %c0_i32_1 = arith.constant 0 : i32
    return %c0_i32, %c0_i32_0 : i32, i32
  }
  func.func @transform_9(%arg0: i32) -> (i32, i32) {
    %c0_i32 = arith.constant 0 : i32
    %c0_i32_0 = arith.constant 0 : i32
    %c0_i32_1 = arith.constant 0 : i32
    return %c0_i32, %c0_i32_0 : i32, i32
  }
  func.func @transform_10(%arg0: i32) -> (i32, i32) {
    %c0_i32 = arith.constant 0 : i32
    %c0_i32_0 = arith.constant 0 : i32
    %c0_i32_1 = arith.constant 0 : i32
    return %c0_i32, %c0_i32_0 : i32, i32
  }
  func.func @transform_11(%arg0: i32) -> (i32, i32) {
    %c0_i32 = arith.constant 0 : i32
    %c0_i32_0 = arith.constant 0 : i32
    %c0_i32_1 = arith.constant 0 : i32
    return %c0_i32, %c0_i32_0 : i32, i32
  }
  func.func @transform_12(%arg0: i32) -> (i32, i32, i32) {
    %c0_i32 = arith.constant 0 : i32
    %c0_i32_0 = arith.constant 0 : i32
    %c0_i32_1 = arith.constant 0 : i32
    %c0_i32_2 = arith.constant 0 : i32
    return %c0_i32, %c0_i32_0, %c0_i32_1 : i32, i32, i32
  }
  func.func @transform_13(%arg0: i32) -> (i32, i32) {
    %c0_i32 = arith.constant 0 : i32
    %c0_i32_0 = arith.constant 0 : i32
    %c0_i32_1 = arith.constant 0 : i32
    return %c0_i32, %c0_i32_0 : i32, i32
  }
  func.func @transform_14(%arg0: i32) -> (i32, i32) {
    %c0_i32 = arith.constant 0 : i32
    %c0_i32_0 = arith.constant 0 : i32
    %c0_i32_1 = arith.constant 0 : i32
    return %c0_i32, %c0_i32_0 : i32, i32
  }
  func.func @transform_15(%arg0: i32) -> (i32, i32) {
    %c0_i32 = arith.constant 0 : i32
    %c0_i32_0 = arith.constant 0 : i32
    %c0_i32_1 = arith.constant 0 : i32
    return %c0_i32, %c0_i32_0 : i32, i32
  }
  func.func @transform_16(%arg0: i32) -> (i32, i32) {
    %c0_i32 = arith.constant 0 : i32
    %c0_i32_0 = arith.constant 0 : i32
    %c0_i32_1 = arith.constant 0 : i32
    return %c0_i32, %c0_i32_0 : i32, i32
  }
  func.func @transform_17(%arg0: i32) -> (i32, i32) {
    %c0_i32 = arith.constant 0 : i32
    %c0_i32_0 = arith.constant 0 : i32
    %c0_i32_1 = arith.constant 0 : i32
    return %c0_i32, %c0_i32_0 : i32, i32
  }
  func.func @transform_18(%arg0: i32) -> (i32, i32, i32) {
    %c0_i32 = arith.constant 0 : i32
    %c0_i32_0 = arith.constant 0 : i32
    %c0_i32_1 = arith.constant 0 : i32
    return %arg0, %c0_i32, %c0_i32_0 : i32, i32, i32
  }
}

</mosaic_0001>

<bundles_post_ra>
// kernel: tpu_custom_call.1
= control target key start
LH: loop header
LB: loop body
LE: loop exit
PB: predicated region body
PF: predicated region fallthrough
CT: control target
= control target key end

     0   :  { %s6247_s0 = inlined_call_operand.hbm [shape: f32[2,8,32], index: 0, kind: input, shape index: {}]   ;;  %s6248_s1 = inlined_call_operand.hbm [shape: f32[2,8,32], index: 1, kind: input, shape index: {}]   ;;  %s6249_s2 = inlined_call_operand.hbm [shape: f32[2,8,8], index: 2, kind: input, shape index: {}]   ;;  %s6250_s3 = inlined_call_operand.hbm [shape: f32[2,8,8], index: 3, kind: input, shape index: {}]   ;;  %s6251_s4 = inlined_call_operand.vmem [shape: f32[32,96], index: 4, kind: input, shape index: {}]   ;;  %s6252_s5 = inlined_call_operand.vmem [shape: f32[1,96], index: 5, kind: input, shape index: {}]   ;;  %s6253_s6 = inlined_call_operand.vmem [shape: f32[4,8,32], index: 6, kind: input, shape index: {}]   ;;  %s6254_s7 = inlined_call_operand.vmem [shape: f32[1,32], index: 7, kind: input, shape index: {}]   ;;  %s6255_s8 = inlined_call_operand.vmem [shape: f32[32,32], index: 8, kind: input, shape index: {}]   ;;  %s6256_s9 = inlined_call_operand.vmem [shape: f32[1,32], index: 9, kind: input, shape index: {}]   ;;  %s6257_s10 = inlined_call_operand.hbm [shape: f32[32,64], index: 10, kind: input, shape index: {}]   ;;  %s6258_s11 = inlined_call_operand.vmem [shape: f32[1,64], index: 11, kind: input, shape index: {}]   ;;  %s6259_s12 = inlined_call_operand.hbm [shape: f32[4,8,32], index: 12, kind: input, shape index: {}]   ;;  %s6260_s13 = inlined_call_operand.vmem [shape: f32[1,32], index: 13, kind: input, shape index: {}]   ;;  %s6261_s14 = inlined_call_operand.hbm [shape: f32[32,64], index: 14, kind: input, shape index: {}]   ;;  %s6262_s15 = inlined_call_operand.vmem [shape: f32[1,64], index: 15, kind: input, shape index: {}]   ;;  %s6263_s16 = inlined_call_operand.vmem [shape: f32[64,32], index: 16, kind: input, shape index: {}]   ;;  %s6264_s17 = inlined_call_operand.vmem [shape: f32[1,32], index: 17, kind: input, shape index: {}]   ;;  %s6265_s18 = inlined_call_operand.hbm [shape: f32[2,8,32], index: 18, kind: output, shape index: {}]  }
   0x1   :  { %6270 = sst [smem:[#allocation20_spill]] %s6247_s0 }
   0x2   :  { %6271 = sst [smem:[#allocation21_spill]] %s6248_s1 }
   0x3   :  { %6272 = sst [smem:[#allocation22_spill]] %s6249_s2 }
   0x4   :  { %6273 = sst [smem:[#allocation23_spill]] %s6265_s18 }
   0x5   :  { %23 = vsyncpa [#allocation3], 0 }
   0x6   :  { %24 = vsyncpa [#allocation6], 0 }
   0x7   :  { %25 = vsyncpa [#allocation9], 0 }
   0x8   :  { %26 = vsyncpa [#allocation12], 0 }
   0x9   :  { %27 = vsyncpa [#allocation4], 0  ;;  %s5439_s27 = smov [#allocation5]   ;;  %s5440_s29 = smov [#allocation8]  }
   0xa   :  { %s45_s28 = sshll.u32 %s5439_s27, 4  ;;  %s69_s30 = sshll.u32 %s5440_s29, 4  ;;  %s46_s28 = int_to_ptr.vmem [resolvable:$true] %s45_s28  ;;  %s5557_s30 = int_to_ptr.vmem [resolvable:$true] %s69_s30 }
   0xb   :  { %s6274_s1 = sld [smem:[#allocation21_spill]] }
  0x11   :  { %s5253_s20 = scalar_lea.hbm %s6274_s1, 256 }
  0x12   :  { %p5254_p0 = scmp.ne.s32.totalorder %s6274_s1, %s5253_s20  ;;  %p5257_p1 = scmp.lt.u32.totalorder %s5253_s20, %s6274_s1 }
  0x14   :  { %p5259_p2 = pnand %p5257_p1, %p5254_p0 }
  0x16   :  { %5262 = shalt.err (!%p5259_p2)
}
  0x17   :  { %s5263_s24 = scalar_lea.vmem %s46_s28, 256  ;;  %p5268_p4 = scmp.lt.s32.totalorder %s46_s28, %s46_s28 }
  0x18   :  { %p5264_p3 = scmp.ne.s32.totalorder %s46_s28, %s5263_s24  ;;  %p5269_p5 = scmp.lt.s32.totalorder %s5263_s24, %s5263_s24 }
  0x1a   :  { %p5270_p6 = por %p5269_p5, %p5268_p4 }
  0x1c   :  { %p5271_p7 = pnand %p5270_p6, %p5264_p3 }
  0x1e   :  { %5274 = shalt.err (!%p5271_p7)
}
  0x1f   :  { %s5441_s25 = smov 128   ;;  %s5442_s26 = smov 8  }
  0x20   :  { %51 = dma.hbm_to_vmem [thread:$0]  %s6274_s1, 256, %s46_s28, [#allocation6], %s5441_s25, %s5441_s25, %s5442_s26  }
  0x21   :  { %s5275_s20 = scalar_lea.hbm %s6250_s3, 256 }
  0x22   :  { %p5276_p8 = scmp.ne.s32.totalorder %s6250_s3, %s5275_s20  ;;  %p5279_p9 = scmp.lt.u32.totalorder %s5275_s20, %s6250_s3 }
  0x24   :  { %p5281_p10 = pnand %p5279_p9, %p5276_p8 }
  0x26   :  { %5284 = shalt.err (!%p5281_p10)
}
  0x27   :  { %s5285_s24 = scalar_lea.vmem %s5557_s30, 256  ;;  %p5290_p12 = scmp.lt.s32.totalorder %s5557_s30, %s5557_s30 }
  0x28   :  { %p5286_p11 = scmp.ne.s32.totalorder %s5557_s30, %s5285_s24  ;;  %p5291_p13 = scmp.lt.s32.totalorder %s5285_s24, %s5285_s24 }
  0x2a   :  { %p5292_p0 = por %p5291_p13, %p5290_p12 }
  0x2c   :  { %p5293_p1 = pnand %p5292_p0, %p5286_p11 }
  0x2e   :  { %5296 = shalt.err (!%p5293_p1)
}
  0x2f   :  { %75 = dma.hbm_to_vmem [thread:$0]  %s6250_s3, 256, %s5557_s30, [#allocation9], %s5441_s25, %s5441_s25, %s5442_s26  }
  0x30   :  { %s5443_s27 = smov [#allocation11]   ;;  %s5444_s0 = smov [#allocation2]  }
  0x31   :  { %s107_s29 = sshll.u32 %s5443_s27, 4  ;;  %s33_s19 = sshll.u32 %s5444_s0, 4  ;;  %s108_s29 = int_to_ptr.vmem [resolvable:$true] %s107_s29  ;;  %s5594_s19 = int_to_ptr.vmem [resolvable:$true] %s33_s19 }
  0x32   :  { %s5297_s22 = scalar_lea.hbm %s6259_s12, 512 }
  0x33   :  { %p5298_p2 = scmp.ne.s32.totalorder %s6259_s12, %s5297_s22  ;;  %p5301_p3 = scmp.lt.u32.totalorder %s5297_s22, %s6259_s12 }
  0x35   :  { %p5303_p4 = pnand %p5301_p3, %p5298_p2 }
  0x37   :  { %5306 = shalt.err (!%p5303_p4)
}
  0x38   :  { %s5307_s3 = scalar_lea.vmem %s108_s29, 512  ;;  %p5312_p6 = scmp.lt.s32.totalorder %s108_s29, %s108_s29 }
  0x39   :  { %p5308_p5 = scmp.ne.s32.totalorder %s108_s29, %s5307_s3  ;;  %p5313_p7 = scmp.lt.s32.totalorder %s5307_s3, %s5307_s3 }
  0x3b   :  { %p5314_p8 = por %p5313_p7, %p5312_p6 }
  0x3d   :  { %p5315_p9 = pnand %p5314_p8, %p5308_p5 }
  0x3f   :  { %5318 = shalt.err (!%p5315_p9)
}
  0x40   :  { %113 = dma.hbm_to_vmem [thread:$0]  %s6259_s12, 512, %s108_s29, [#allocation12], %s5441_s25, %s5441_s25, %s5442_s26  }
  0x41   :  { %s6275_s18 = sld [smem:[#allocation20_spill]] }
  0x47   :  { %s5319_s0 = scalar_lea.hbm %s6275_s18, 256 }
  0x48   :  { %p5320_p10 = scmp.ne.s32.totalorder %s6275_s18, %s5319_s0  ;;  %p5323_p11 = scmp.lt.u32.totalorder %s5319_s0, %s6275_s18 }
  0x4a   :  { %p5325_p12 = pnand %p5323_p11, %p5320_p10 }
  0x4c   :  { %5328 = shalt.err (!%p5325_p12)
}
  0x4d   :  { %s5329_s23 = scalar_lea.vmem %s5594_s19, 256  ;;  %p5334_p0 = scmp.lt.s32.totalorder %s5594_s19, %s5594_s19 }
  0x4e   :  { %p5330_p13 = scmp.ne.s32.totalorder %s5594_s19, %s5329_s23  ;;  %p5335_p1 = scmp.lt.s32.totalorder %s5329_s23, %s5329_s23 }
  0x50   :  { %p5336_p2 = por %p5335_p1, %p5334_p0 }
  0x52   :  { %p5337_p3 = pnand %p5336_p2, %p5330_p13 }
  0x54   :  { %5340 = shalt.err (!%p5337_p3)
}
  0x55   :  { %39 = dma.hbm_to_vmem [thread:$0]  %s6275_s18, 256, %s5594_s19, [#allocation3], %s5441_s25, %s5441_s25, %s5442_s26  }
  0x56   :  { %s5445_s24 = smov [#allocation7]   ;;  %s5446_s30 = smov [#allocation10]  }
  0x57   :  { %s57_s3 = sshll.u32 %s5445_s24, 4  ;;  %s93_s28 = sshll.u32 %s5446_s30, 4  ;;  %s58_s3 = int_to_ptr.vmem [resolvable:$true] %s57_s3  ;;  %s5631_s28 = int_to_ptr.vmem [resolvable:$true] %s93_s28 }
  0x58   :  { %s6276_s0 = sld [smem:[#allocation22_spill]] }
  0x5e   :  { %s5341_s20 = scalar_lea.hbm %s6276_s0, 256 }
  0x5f   :  { %p5342_p4 = scmp.ne.s32.totalorder %s6276_s0, %s5341_s20  ;;  %p5345_p5 = scmp.lt.u32.totalorder %s5341_s20, %s6276_s0 }
  0x61   :  { %p5347_p6 = pnand %p5345_p5, %p5342_p4 }
  0x63   :  { %5350 = shalt.err (!%p5347_p6)
}
  0x64   :  { %s5351_s19 = scalar_lea.vmem %s58_s3, 256  ;;  %p5356_p8 = scmp.lt.s32.totalorder %s58_s3, %s58_s3 }
  0x65   :  { %p5352_p7 = scmp.ne.s32.totalorder %s58_s3, %s5351_s19  ;;  %p5357_p9 = scmp.lt.s32.totalorder %s5351_s19, %s5351_s19 }
  0x67   :  { %p5358_p10 = por %p5357_p9, %p5356_p8 }
  0x69   :  { %p5359_p11 = pnand %p5358_p10, %p5352_p7 }
  0x6b   :  { %5362 = shalt.err (!%p5359_p11)
}
  0x6c   :  { %63 = dma.hbm_to_vmem [thread:$0]  %s6276_s0, 256, %s58_s3, [#allocation6], %s5441_s25, %s5441_s25, %s5442_s26  }
  0x6d   :  { %s5363_s30 = scalar_lea.hbm %s6257_s10, 512 }
  0x6e   :  { %p5364_p12 = scmp.ne.s32.totalorder %s6257_s10, %s5363_s30  ;;  %p5367_p13 = scmp.lt.u32.totalorder %s5363_s30, %s6257_s10 }
  0x70   :  { %p5369_p0 = pnand %p5367_p13, %p5364_p12 }
  0x72   :  { %5372 = shalt.err (!%p5369_p0)
}
  0x73   :  { %s5373_s22 = scalar_lea.vmem %s5631_s28, 512  ;;  %p5378_p2 = scmp.lt.s32.totalorder %s5631_s28, %s5631_s28 }
  0x74   :  { %p5374_p1 = scmp.ne.s32.totalorder %s5631_s28, %s5373_s22  ;;  %p5379_p3 = scmp.lt.s32.totalorder %s5373_s22, %s5373_s22 }
  0x76   :  { %p5380_p4 = por %p5379_p3, %p5378_p2 }
  0x78   :  { %p5381_p5 = pnand %p5380_p4, %p5374_p1 }
  0x7a   :  { %5384 = shalt.err (!%p5381_p5)
}
  0x7b   :  { %99 = dma.hbm_to_vmem [thread:$0]  %s6257_s10, 512, %s5631_s28, [#allocation9], %s5441_s25, %s5441_s25, %s5442_s26  }
  0x7c   :  { %s5447_s2 = smov [#allocation13]   ;;  %s5385_s12 = scalar_lea.hbm %s6261_s14, 512 }
  0x7d   :  { %s121_s23 = sshll.u32 %s5447_s2, 4  ;;  %p5386_p6 = scmp.ne.s32.totalorder %s6261_s14, %s5385_s12  ;;  %s122_s23 = int_to_ptr.vmem [resolvable:$true] %s121_s23 }
  0x7e   :  { %p5389_p7 = scmp.lt.u32.totalorder %s5385_s12, %s6261_s14 }
  0x80   :  { %p5391_p8 = pnand %p5389_p7, %p5386_p6 }
  0x82   :  { %5394 = shalt.err (!%p5391_p8)
}
  0x83   :  { %s5395_s27 = scalar_lea.vmem %s122_s23, 512  ;;  %p5400_p10 = scmp.lt.s32.totalorder %s122_s23, %s122_s23 }
  0x84   :  { %p5396_p9 = scmp.ne.s32.totalorder %s122_s23, %s5395_s27  ;;  %p5401_p11 = scmp.lt.s32.totalorder %s5395_s27, %s5395_s27 }
  0x86   :  { %p5402_p12 = por %p5401_p11, %p5400_p10 }
  0x88   :  { %p5403_p13 = pnand %p5402_p12, %p5396_p9 }
  0x8a   :  { %5406 = shalt.err (!%p5403_p13)
}
  0x8b   :  { %127 = dma.hbm_to_vmem [thread:$0]  %s6261_s14, 512, %s122_s23, [#allocation12], %s5441_s25, %s5441_s25, %s5442_s26  }
  0x8c   :  { %5429 = dma.done.wait [#allocation3], 256  }
  0x8d   :  { %5430 = vsyncadd [#allocation3], 4294967040 }
  0x8e   :  { %5431 = dma.done.wait [#allocation6], 512  }
  0x8f   :  { %5432 = vsyncadd [#allocation6], 4294966784 }
  0x90   :  { %5433 = dma.done.wait [#allocation9], 768  }
  0x91   :  { %5434 = vsyncadd [#allocation9], 4294966528 }
  0x92   :  { %5435 = dma.done.wait [#allocation12], 1024  }
  0x93   :  { %5436 = vsyncadd [#allocation12], 4294966272  ;;  %vm159_vm0 = vcmask 261120   ;;  %v5683_v0 = vld [vmem:[#allocation2] sm:$0xff]  ;;  %v5685_v1 = vld [vmem:[#allocation2 + $0x8] sm:$0xff]  ;;  %v5448_v30 = vmov 0.0  }
  0x94   :  { %v160_v2 = vsel %vm159_vm0, %v5683_v0, 0.0  ;;  %v163_v3 = vsel %vm159_vm0, %v5685_v1, 0.0  ;;  %v187_v14 = vld [vmem:[%s6251_s4] sm:$0xff]  ;;  %v188_v15 = vld [vmem:[%s6251_s4 + $0x8] sm:$0xff]  ;;  %v189_v16 = vld [vmem:[%s6251_s4 + $0x10] sm:$0xff]  ;;  %4823 = vmatprep.subr.mxu1 %v5448_v30  ;;  %vm5449_vm1 = vmmov 0  }
  0x95   :  { %161 = vadd.xlane.f32.xlu0 %v160_v2  ;;  %v5110_v17 = vpack.c.bf16 %v188_v15, %v187_v14  ;;  %v190_v18 = vld [vmem:[%s6251_s4 + $0x18] sm:$0xff]  ;;  %4825 = vmatprep.mubr.msk.f32.mxu1 %vm5449_vm1, %v5448_v30  ;;  %v4593_v31 = vld [vmem:[%s6252_s5] ss:$0 sm:$0xff]  ;;  %s5450_s18 = smov 88   ;;  %s5451_s12 = smov 96   ;;  %vm284_vm2 = vcmask 64512  }
  0x96   :  { %v5114_v19 = vpack.c.bf16 %v190_v18, %v189_v16  ;;  %s5452_s29 = smov 120   ;;  %v5739_v39 = vld [vmem:[#allocation7] sm:$0xff]  ;;  %s5453_s5 = smov 64   ;;  %v5762_v61 = vld [vmem:[%s6253_s6 + $0x8] sm:$0xff]  ;;  %vm4487_vm7 = vcmask 523264  }
  0x97   :  { %5111 = vmatprep.subr.bf16.mxu0 %v5110_v17  ;;  %vm280_vm3 = vcmp.eq.f32.partialorder %v5739_v39, 0.0  ;;  %s5454_s24 = smov 80   ;;  %s5455_s30 = smov 112  }
  0x98   :  { %5113 = vmatpush3.bf16.msra.mxu0 %v5110_v17  ;;  %s5456_s1 = smov 56   ;;  %s5457_s20 = smov 72  }
  0x99   :  { %164 = vadd.xlane.f32.xlu0 %v163_v3  ;;  %5115 = vmatprep.subr.bf16.mxu0 %v5114_v19  ;;  %s5458_s21 = smov 104   ;;  %s5459_s22 = smov 48  }
  0x9a   :  { %s5460_s2 = smov 40  }
  0x9c   :  { %5117 = vmatpush3.bf16.msra.mxu0 %v5114_v19 }
  0x9d   :  { %4818 = vmatprep.subr.mxu0 %v5448_v30 }
 0x122   :  { %v162_v4 = vpop.xlane.xlu0 %161 }
 0x123   :  { %v167_v5 = vmul.f32 0.03125, %v162_v4 }
 0x125   :  { %v169_v6 = vsub.f32 %v5683_v0, %v167_v5 }
 0x126   :  { %v165_v7 = vpop.xlane.xlu0 %164 }
 0x127   :  { %v168_v8 = vmul.f32 0.03125, %v165_v7  ;;  %v171_v9 = vmul.f32 %v169_v6, %v169_v6  ;;  %v5776_v7 = vld [vmem:[%s6253_s6] sm:$0xff] }
 0x129   :  { %v170_v10 = vsub.f32 %v5685_v1, %v168_v8  ;;  %v173_v11 = vsel %vm159_vm0, %v171_v9, 0.0 }
 0x12a   :  { %174 = vadd.xlane.f32.xlu1 %v173_v11 }
 0x12b   :  { %v172_v12 = vmul.f32 %v170_v10, %v170_v10 }
 0x12d   :  { %v176_v13 = vsel %vm159_vm0, %v172_v12, 0.0 }
 0x12e   :  { %177 = vadd.xlane.f32.xlu1 %v176_v13 }
 0x1b7   :  { %v175_v20 = vpop.xlane.xlu1 %174 }
 0x1b8   :  { %v179_v21 = vmul.f32 0.032258064, %v175_v20 }
 0x1ba   :  { %v181_v22 = vadd.f32 1e-06, %v179_v21 }
 0x1bb   :  { %v178_v23 = vpop.xlane.xlu1 %177 }
 0x1bc   :  { %5181 = vrsqrt.f32 %v181_v22  ;;  %v180_v24 = vmul.f32 0.032258064, %v178_v23 }
 0x1be   :  { %v182_v25 = vadd.f32 1e-06, %v180_v24 }
 0x1c0   :  { %5183 = vrsqrt.f32 %v182_v25 }
 0x1c6   :  { %v5182_v26 = vpop.eup %5181 }
 0x1c7   :  { %v185_v27 = vmul.f32 %v5182_v26, %v169_v6 }
 0x1c9   :  { %4815 = vmatprep.mubr.msk.f32.mxu0 %vm159_vm0, %v185_v27 }
 0x1ca   :  { %v5184_v28 = vpop.eup %5183 }
 0x1cb   :  { %v186_v29 = vmul.f32 %v5184_v28, %v170_v10 }
 0x1cd   :  { %4816 = vmatmul.mubr.msk.f32.vlgmr.msra.gmra.mrb[0].mxu0 %vm159_vm0, %v186_v29 }
 0x1ce   :  { %4820 = vmatprep.mubr.msk.f32.mxu0 %vm5449_vm1, %v5448_v30 }
 0x2a0   :  { %v4817_v32 = vpop.f32.mrb[0].mxu0 }
 0x2a1   :  { %v5718_v33 = vadd.f32 %v4817_v32, %v4593_v31  ;;  %v270_v34 = vpop.f32.mrb[1].mxu0 }
 0x2a2   :  { %v5720_v35 = vadd.f32 %v4593_v31, %v270_v34 }
 0x2a4   :  { %451 = vrot.lane.b32.xlu1 %v5720_v35, %s5450_s18  ;;  %282 = vrot.lane.b32.xlu0 %v5720_v35, %s5451_s12 }
 0x2a8   :  { %449 = vrot.lane.b32.xlu1 %v5720_v35, %s5452_s29 }
 0x316   :  { %v283_v36 = vpop.permute.xlu0 %282  ;;  %v452_v37 = vpop.permute.xlu1 %451 }
 0x317   :  { %4819 = vmatpush3.xpose.msk.msra.mxu0 %vm284_vm2, %v283_v36 }
 0x318   :  { %4828 = vmatprep.subr.mxu0 %v5448_v30 }
 0x31a   :  { %4821 = vmatmul.mubr.msk.f32.vlgmr.msra.gmra.mrb[2].mxu0 %vm284_vm2, %v5720_v35  ;;  %v450_v38 = vpop.permute.xlu1 %449 }
 0x31b   :  { %4829 = vmatpush3.xpose.msk.msra.mxu0 %vm284_vm2, %v452_v37  ;;  %4830 = vmatprep.mubr.msk.f32.mxu0 %vm5449_vm1, %v5448_v30 }
 0x31c   :  { %4838 = vmatprep.subr.mxu0 %v5448_v30 }
 0x31e   :  { %4831 = vmatmul.mubr.msk.f32.vlgmr.msra.gmra.mrb[4].mxu0 %vm284_vm2, %v450_v38  ;;  %v5817_v38 = vld [vmem:[%s6253_s6 + $0x10] sm:$0xff] }
 0x31f   :  { %4840 = vmatprep.mubr.msk.f32.mxu0 %vm5449_vm1, %v5448_v30  ;;  %4839 = vmatpush3.msra.mxu0 %v5762_v61 }
 0x320   :  { %4848 = vmatprep.subr.mxu0 %v5448_v30 }
 0x3ed   :  { %v355_v40 = vpop.f32.mrb[2].mxu0 }
 0x3ee   :  { %v359_v41 = vmul.f32 0.35355338, %v355_v40  ;;  %v4822_v42 = vpop.f32.mrb[3].mxu0 }
 0x3f0   :  { %v360_v43 = vsel %vm280_vm3, -1e+09, %v359_v41 }
 0x3f1   :  { %v523_v44 = vpop.f32.mrb[4].mxu0  ;;  %v361_v45 = vsel %vm284_vm2, %v360_v43, -inf }
 0x3f2   :  { %v527_v46 = vmul.f32 0.35355338, %v523_v44  ;;  %362 = vmax.xlane.f32.xlu1 %v361_v45  ;;  %v4832_v47 = vpop.f32.mrb[5].mxu0 }
 0x3f4   :  { %v528_v48 = vsel %vm280_vm3, -1e+09, %v527_v46 }
 0x3f5   :  { %v529_v49 = vsel %vm284_vm2, %v528_v48, -inf }
 0x3f6   :  { %530 = vmax.xlane.f32.xlu0 %v529_v49 }
 0x403   :  { %372 = vrot.lane.b32.xlu1 %v5720_v35, %s5453_s5 }
 0x407   :  { %766 = vrot.lane.b32.xlu1 %v5720_v35, %s5454_s24 }
 0x40b   :  { %764 = vrot.lane.b32.xlu1 %v5720_v35, %s5455_s30 }
 0x47f   :  { %v363_v50 = vpop.xlane.xlu1 %362 }
 0x480   :  { %v364_v51 = vsub.f32 %v360_v43, %v363_v50 }
 0x482   :  { %v365_v52 = vmul.f32 1.442695, %v364_v51 }
 0x483   :  { %v373_v53 = vpop.permute.xlu1 %372  ;;  %v531_v54 = vpop.xlane.xlu0 %530 }
 0x484   :  { %5185 = vpow2.f32 %v365_v52  ;;  %v532_v55 = vsub.f32 %v528_v48, %v531_v54  ;;  %4824 = vmatpush3.msra.mxu1 %v373_v53 }
 0x485   :  { %4833 = vmatprep.subr.mxu1 %v5448_v30 }
 0x486   :  { %v533_v56 = vmul.f32 1.442695, %v532_v55 }
 0x487   :  { %v767_v10 = vpop.permute.xlu1 %766 }
 0x488   :  { %5187 = vpow2.f32 %v533_v56 }
 0x48b   :  { %v765_v13 = vpop.permute.xlu1 %764 }
 0x48e   :  { %v5186_v57 = vpop.eup %5185 }
 0x48f   :  { %v367_v58 = vsel %vm284_vm2, %v5186_v57, 0.0 }
 0x490   :  { %368 = vadd.xlane.f32.xlu0 %v367_v58 }
 0x492   :  { %v5188_v59 = vpop.eup %5187 }
 0x493   :  { %v535_v60 = vsel %vm284_vm2, %v5188_v59, 0.0 }
 0x494   :  { %536 = vadd.xlane.f32.xlu0 %v535_v60  ;;  %v5855_v60 = vld [vmem:[%s6253_s6 + $0x18] sm:$0xff] }
 0x4aa   :  { %540 = vrot.lane.b32.xlu0 %v5720_v35, %s5456_s1 }
 0x51d   :  { %v369_v62 = vpop.xlane.xlu0 %368 }
 0x51e   :  { %5189 = vrcp.f32 %v369_v62 }
 0x521   :  { %v537_v63 = vpop.xlane.xlu0 %536 }
 0x522   :  { %5191 = vrcp.f32 %v537_v63 }
 0x525   :  { %v541_v4 = vpop.permute.xlu0 %540 }
 0x528   :  { %v5190_v2 = vpop.eup %5189 }
 0x529   :  { %v371_v3 = vmul.f32 %v5190_v2, %v5186_v57  ;;  %v5860_v2 = vld [vmem:[#allocation7 + $0x8] sm:$0xff] }
 0x52a   :  { %vm1252_vm4 = vcmp.eq.f32.partialorder %v5860_v2, 0.0 }
 0x52b   :  { %4826 = vmatmul.mubr.msk.f32.vlgmr.msra.gmra.mrb[0].mxu1 %vm284_vm2, %v371_v3 }
 0x52c   :  { %v5192_v5 = vpop.eup %5191  ;;  %4834 = vmatpush3.msra.mxu1 %v541_v4  ;;  %4835 = vmatprep.mubr.msk.f32.mxu1 %vm5449_vm1, %v5448_v30 }
 0x52d   :  { %v539_v6 = vmul.f32 %v5192_v5, %v5188_v59  ;;  %4843 = vmatprep.subr.mxu1 %v5448_v30 }
 0x52f   :  { %4836 = vmatmul.mubr.msk.f32.vlgmr.msra.gmra.mrb[2].mxu1 %vm284_vm2, %v539_v6 }
 0x530   :  { %4845 = vmatprep.mubr.msk.f32.mxu1 %vm5449_vm1, %v5448_v30  ;;  %4844 = vmatpush3.msra.mxu1 %v5776_v7 }
 0x531   :  { %4853 = vmatprep.subr.mxu1 %v5448_v30 }
 0x5fe   :  { %v444_v8 = vpop.f32.mrb[0].mxu1 }
 0x5ff   :  { %v4827_v9 = vpop.f32.mrb[1].mxu1  ;;  %4846 = vmatmul.mubr.msk.f32.vlgmr.msra.gmra.mrb[4].mxu1 %vm284_vm2, %v444_v8 }
 0x600   :  { %4855 = vmatprep.mubr.msk.f32.mxu1 %vm5449_vm1, %v5448_v30 }
 0x602   :  { %v612_v11 = vpop.f32.mrb[2].mxu1 }
 0x603   :  { %v4837_v12 = vpop.f32.mrb[3].mxu1  ;;  %4841 = vmatmul.mubr.msk.f32.vlgmr.msra.gmra.mrb[6].mxu0 %vm284_vm2, %v612_v11 }
 0x604   :  { %4849 = vmatpush3.xpose.msk.msra.mxu0 %vm284_vm2, %v767_v10  ;;  %4850 = vmatprep.mubr.msk.f32.mxu0 %vm5449_vm1, %v5448_v30 }
 0x605   :  { %4858 = vmatprep.subr.mxu0 %v5448_v30 }
 0x607   :  { %4851 = vmatmul.mubr.msk.f32.vlgmr.msra.gmra.mrb[8].mxu0 %vm284_vm2, %v765_v13 }
 0x608   :  { %4860 = vmatprep.mubr.msk.f32.mxu0 %vm5449_vm1, %v5448_v30  ;;  %4859 = vmatpush3.msra.mxu0 %v5817_v38 }
 0x609   :  { %4868 = vmatprep.subr.mxu0 %v5448_v30 }
 0x6d2   :  { %v760_v14 = vpop.f32.mrb[4].mxu1 }
 0x6d3   :  { %v4847_v15 = vpop.f32.mrb[5].mxu1 }
 0x6d6   :  { %v687_v16 = vpop.f32.mrb[6].mxu0 }
 0x6d7   :  { %v5791_v17 = vadd.f32 %v760_v14, %v687_v16  ;;  %v4842_v18 = vpop.f32.mrb[7].mxu0 }
 0x6da   :  { %v838_v19 = vpop.f32.mrb[8].mxu0 }
 0x6db   :  { %v842_v20 = vmul.f32 0.35355338, %v838_v19  ;;  %v4852_v21 = vpop.f32.mrb[9].mxu0 }
 0x6dd   :  { %v843_v22 = vsel %vm280_vm3, -1e+09, %v842_v20 }
 0x6de   :  { %v844_v23 = vsel %vm284_vm2, %v843_v22, -inf }
 0x6df   :  { %845 = vmax.xlane.f32.xlu1 %v844_v23 }
 0x6f0   :  { %1009 = vrot.lane.b32.xlu1 %v5720_v35, %s5457_s20 }
 0x6f4   :  { %1007 = vrot.lane.b32.xlu1 %v5720_v35, %s5458_s21 }
 0x6f8   :  { %1254 = vrot.lane.b32.xlu1 %v5718_v33, %s5451_s12 }
 0x76c   :  { %v846_v24 = vpop.xlane.xlu1 %845 }
 0x76d   :  { %v847_v25 = vsub.f32 %v843_v22, %v846_v24 }
 0x76f   :  { %v848_v26 = vmul.f32 1.442695, %v847_v25 }
 0x770   :  { %v1010_v34 = vpop.permute.xlu1 %1009 }
 0x771   :  { %5193 = vpow2.f32 %v848_v26 }
 0x774   :  { %v1008_v37 = vpop.permute.xlu1 %1007 }
 0x778   :  { %v1255_v54 = vpop.permute.xlu1 %1254 }
 0x77b   :  { %v5194_v27 = vpop.eup %5193 }
 0x77c   :  { %v850_v28 = vsel %vm284_vm2, %v5194_v27, 0.0 }
 0x77d   :  { %851 = vadd.xlane.f32.xlu0 %v850_v28 }
 0x793   :  { %855 = vrot.lane.b32.xlu0 %v5720_v35, %s5459_s22 }
 0x80a   :  { %v852_v29 = vpop.xlane.xlu0 %851 }
 0x80b   :  { %5195 = vrcp.f32 %v852_v29 }
 0x80e   :  { %v856_v31 = vpop.permute.xlu0 %855 }
 0x80f   :  { %4854 = vmatpush3.msra.mxu1 %v856_v31 }
 0x810   :  { %4863 = vmatprep.subr.mxu1 %v5448_v30 }
 0x815   :  { %v5196_v32 = vpop.eup %5195 }
 0x816   :  { %v854_v36 = vmul.f32 %v5196_v32, %v5194_v27 }
 0x818   :  { %4856 = vmatmul.mubr.msk.f32.vlgmr.msra.gmra.mrb[6].mxu1 %vm284_vm2, %v854_v36 }
 0x819   :  { %4864 = vmatpush3.xpose.msk.msra.mxu1 %vm284_vm2, %v1010_v34  ;;  %4865 = vmatprep.mubr.msk.f32.mxu1 %vm5449_vm1, %v5448_v30 }
 0x81a   :  { %4873 = vmatprep.subr.mxu1 %v5448_v30 }
 0x81c   :  { %4866 = vmatmul.mubr.msk.f32.vlgmr.msra.gmra.mrb[8].mxu1 %vm284_vm2, %v1008_v37 }
 0x81d   :  { %4875 = vmatprep.mubr.msk.f32.mxu1 %vm5449_vm1, %v5448_v30  ;;  %4874 = vmatpush3.msra.mxu1 %v5855_v60 }
 0x81e   :  { %4883 = vmatprep.subr.mxu1 %v5448_v30 }
 0x8eb   :  { %v927_v40 = vpop.f32.mrb[6].mxu1 }
 0x8ec   :  { %v4857_v41 = vpop.f32.mrb[7].mxu1  ;;  %4861 = vmatmul.mubr.msk.f32.vlgmr.msra.gmra.mrb[10].mxu0 %vm284_vm2, %v927_v40 }
 0x8ed   :  { %4870 = vmatprep.mubr.msk.f32.mxu0 %vm5449_vm1, %v5448_v30 }
 0x8ef   :  { %v1081_v42 = vpop.f32.mrb[8].mxu1 }
 0x8f0   :  { %v1085_v43 = vmul.f32 0.35355338, %v1081_v42  ;;  %v4867_v44 = vpop.f32.mrb[9].mxu1 }
 0x8f2   :  { %v1086_v45 = vsel %vm280_vm3, -1e+09, %v1085_v43 }
 0x8f3   :  { %v1087_v46 = vsel %vm284_vm2, %v1086_v45, -inf }
 0x8f4   :  { %1088 = vmax.xlane.f32.xlu0 %v1087_v46 }
 0x90a   :  { %1098 = vrot.lane.b32.xlu0 %v5720_v35, %s5460_s2 }
 0x90e   :  { %1421 = vrot.lane.b32.xlu0 %v5718_v33, %s5450_s18 }
 0x981   :  { %v1089_v47 = vpop.xlane.xlu0 %1088 }
 0x982   :  { %v1090_v48 = vsub.f32 %v1086_v45, %v1089_v47 }
 0x984   :  { %v1091_v49 = vmul.f32 1.442695, %v1090_v48 }
 0x985   :  { %v1099_v50 = vpop.permute.xlu0 %1098 }
 0x986   :  { %5197 = vpow2.f32 %v1091_v49  ;;  %4869 = vmatpush3.msra.mxu0 %v1099_v50 }
 0x987   :  { %4878 = vmatprep.subr.mxu0 %v5448_v30 }
 0x989   :  { %v1422_v58 = vpop.permute.xlu0 %1421 }
 0x990   :  { %v5198_v39 = vpop.eup %5197 }
 0x991   :  { %v1093_v51 = vsel %vm284_vm2, %v5198_v39, 0.0 }
 0x992   :  { %1094 = vadd.xlane.f32.xlu1 %v1093_v51 }
 0x9a3   :  { %1419 = vrot.lane.b32.xlu1 %v5718_v33, %s5452_s29 }
 0x9bf   :  { %v1002_v52 = vpop.f32.mrb[10].mxu0 }
 0x9c0   :  { %v1006_v35 = vadd.f32 %v1002_v52, %v5791_v17  ;;  %v4862_v53 = vpop.f32.mrb[11].mxu0 }
 0xa1f   :  { %v1095_v55 = vpop.xlane.xlu1 %1094 }
 0xa20   :  { %5199 = vrcp.f32 %v1095_v55 }
 0xa23   :  { %v1420_v59 = vpop.permute.xlu1 %1419 }
 0xa2a   :  { %v5200_v56 = vpop.eup %5199 }
 0xa2b   :  { %v1097_v57 = vmul.f32 %v5200_v56, %v5198_v39 }
 0xa2d   :  { %4871 = vmatmul.mubr.msk.f32.vlgmr.msra.gmra.mrb[12].mxu0 %vm284_vm2, %v1097_v57 }
 0xa2e   :  { %4879 = vmatpush3.xpose.msk.msra.mxu0 %vm284_vm2, %v1255_v54  ;;  %4880 = vmatprep.mubr.msk.f32.mxu0 %vm5449_vm1, %v5448_v30 }
 0xa2f   :  { %4888 = vmatprep.subr.mxu0 %v5448_v30 }
 0xa31   :  { %4881 = vmatmul.mubr.msk.f32.vlgmr.msra.gmra.mrb[14].mxu0 %vm284_vm2, %v5718_v33 }
 0xa32   :  { %4889 = vmatpush3.xpose.msk.msra.mxu0 %vm284_vm2, %v1422_v58  ;;  %4890 = vmatprep.mubr.msk.f32.mxu0 %vm5449_vm1, %v5448_v30 }
 0xa33   :  { %4898 = vmatprep.subr.mxu0 %v5448_v30 }
 0xa35   :  { %4891 = vmatmul.mubr.msk.f32.vlgmr.msra.gmra.mrb[16].mxu0 %vm284_vm2, %v1420_v59 }
 0xa36   :  { %4899 = vmatpush3.msra.mxu0 %v5762_v61  ;;  %4900 = vmatprep.mubr.msk.f32.mxu0 %vm5449_vm1, %v5448_v30 }
 0xa37   :  { %4908 = vmatprep.subr.mxu0 %v5448_v30 }
 0xb00   :  { %v1170_v62 = vpop.f32.mrb[12].mxu0 }
 0xb01   :  { %v4872_v63 = vpop.f32.mrb[13].mxu0  ;;  %4876 = vmatmul.mubr.msk.f32.vlgmr.msra.gmra.mrb[10].mxu1 %vm284_vm2, %v1170_v62 }
 0xb02   :  { %4885 = vmatprep.mubr.msk.f32.mxu1 %vm5449_vm1, %v5448_v30 }
 0xb04   :  { %v1326_v61 = vpop.f32.mrb[14].mxu0 }
 0xb05   :  { %v1330_v3 = vmul.f32 0.35355338, %v1326_v61  ;;  %v4882_v4 = vpop.f32.mrb[15].mxu0 }
 0xb07   :  { %v1331_v5 = vsel %vm1252_vm4, -1e+09, %v1330_v3  ;;  %v4631_v3 = vld [vmem:[%s6254_s7] ss:$0 sm:$0xff] }
 0xb08   :  { %v1493_v6 = vpop.f32.mrb[16].mxu0  ;;  %v1332_v8 = vsel %vm284_vm2, %v1331_v5, -inf }
 0xb09   :  { %v1497_v9 = vmul.f32 0.35355338, %v1493_v6  ;;  %1333 = vmax.xlane.f32.xlu0 %v1332_v8  ;;  %v4892_v10 = vpop.f32.mrb[17].mxu0 }
 0xb0b   :  { %v1498_v11 = vsel %vm1252_vm4, -1e+09, %v1497_v9 }
 0xb0c   :  { %v1499_v12 = vsel %vm284_vm2, %v1498_v11, -inf }
 0xb0d   :  { %1500 = vmax.xlane.f32.xlu1 %v1499_v12 }
 0xb1e   :  { %1510 = vrot.lane.b32.xlu1 %v5718_v33, %s5456_s1 }
 0xb22   :  { %1734 = vrot.lane.b32.xlu1 %v5718_v33, %s5454_s24 }
 0xb26   :  { %1732 = vrot.lane.b32.xlu1 %v5718_v33, %s5455_s30 }
 0xb96   :  { %v1334_v13 = vpop.xlane.xlu0 %1333 }
 0xb97   :  { %v1335_v14 = vsub.f32 %v1331_v5, %v1334_v13 }
 0xb99   :  { %v1336_v15 = vmul.f32 1.442695, %v1335_v14 }
 0xb9a   :  { %v1501_v16 = vpop.xlane.xlu1 %1500 }
 0xb9b   :  { %5201 = vpow2.f32 %v1336_v15  ;;  %v1502_v17 = vsub.f32 %v1498_v11, %v1501_v16 }
 0xb9d   :  { %v1503_v18 = vmul.f32 1.442695, %v1502_v17 }
 0xb9e   :  { %v1511_v32 = vpop.permute.xlu1 %1510 }
 0xb9f   :  { %5203 = vpow2.f32 %v1503_v18 }
 0xba2   :  { %v1735_v41 = vpop.permute.xlu1 %1734 }
 0xba5   :  { %v5202_v19 = vpop.eup %5201 }
 0xba6   :  { %v1338_v20 = vsel %vm284_vm2, %v5202_v19, 0.0 }
 0xba7   :  { %1339 = vadd.xlane.f32.xlu0 %v1338_v20 }
 0xba9   :  { %v5204_v21 = vpop.eup %5203 }
 0xbaa   :  { %v1505_v22 = vsel %vm284_vm2, %v5204_v21, 0.0 }
 0xbab   :  { %1506 = vadd.xlane.f32.xlu0 %v1505_v22 }
 0xbc1   :  { %1343 = vrot.lane.b32.xlu0 %v5718_v33, %s5453_s5 }
 0xbd4   :  { %v1245_v23 = vpop.f32.mrb[10].mxu1 }
 0xbd5   :  { %v5881_v24 = vadd.f32 %v1245_v23, %v1006_v35  ;;  %v4877_v25 = vpop.f32.mrb[11].mxu1 }
 0xbd7   :  { %v2221_v5 = vadd.f32 %v4631_v3, %v5881_v24 }
 0xbd9   :  { %v5936_v10 = vadd.f32 %v2221_v5, %v5683_v0 }
 0xbdb   :  { %v2225_v12 = vsel %vm159_vm0, %v5936_v10, 0.0 }
 0xc34   :  { %v1340_v26 = vpop.xlane.xlu0 %1339 }
 0xc35   :  { %5205 = vrcp.f32 %v1340_v26 }
 0xc38   :  { %v1507_v27 = vpop.xlane.xlu0 %1506 }
 0xc39   :  { %5207 = vrcp.f32 %v1507_v27 }
 0xc3c   :  { %v1344_v28 = vpop.permute.xlu0 %1343 }
 0xc3d   :  { %4884 = vmatpush3.msra.mxu1 %v1344_v28 }
 0xc3e   :  { %4893 = vmatprep.subr.mxu1 %v5448_v30 }
 0xc3f   :  { %v5206_v29 = vpop.eup %5205 }
 0xc40   :  { %v1342_v31 = vmul.f32 %v5206_v29, %v5202_v19 }
 0xc42   :  { %4886 = vmatmul.mubr.msk.f32.vlgmr.msra.gmra.mrb[12].mxu1 %vm284_vm2, %v1342_v31 }
 0xc43   :  { %v5208_v34 = vpop.eup %5207  ;;  %4894 = vmatpush3.msra.mxu1 %v1511_v32  ;;  %4895 = vmatprep.mubr.msk.f32.mxu1 %vm5449_vm1, %v5448_v30 }
 0xc44   :  { %v1509_v36 = vmul.f32 %v5208_v34, %v5204_v21  ;;  %4903 = vmatprep.subr.mxu1 %v5448_v30 }
 0xc46   :  { %4896 = vmatmul.mubr.msk.f32.vlgmr.msra.gmra.mrb[14].mxu1 %vm284_vm2, %v1509_v36 }
 0xc47   :  { %4904 = vmatpush3.msra.mxu1 %v5776_v7  ;;  %4905 = vmatprep.mubr.msk.f32.mxu1 %vm5449_vm1, %v5448_v30  ;;  %v1733_v7 = vpop.permute.xlu1 %1732 }
 0xc48   :  { %4913 = vmatprep.subr.mxu1 %v5448_v30 }
 0xd15   :  { %v1415_v37 = vpop.f32.mrb[12].mxu1 }
 0xd16   :  { %v4887_v40 = vpop.f32.mrb[13].mxu1  ;;  %4906 = vmatmul.mubr.msk.f32.vlgmr.msra.gmra.mrb[16].mxu1 %vm284_vm2, %v1415_v37 }
 0xd17   :  { %4915 = vmatprep.mubr.msk.f32.mxu1 %vm5449_vm1, %v5448_v30 }
 0xd19   :  { %v1582_v42 = vpop.f32.mrb[14].mxu1 }
 0xd1a   :  { %v4897_v43 = vpop.f32.mrb[15].mxu1  ;;  %4901 = vmatmul.mubr.msk.f32.vlgmr.msra.gmra.mrb[18].mxu0 %vm284_vm2, %v1582_v42 }
 0xd1b   :  { %4909 = vmatpush3.xpose.msk.msra.mxu0 %vm284_vm2, %v1735_v41  ;;  %4910 = vmatprep.mubr.msk.f32.mxu0 %vm5449_vm1, %v5448_v30 }
 0xd1c   :  { %4918 = vmatprep.subr.mxu0 %v5448_v30 }
 0xd1e   :  { %4911 = vmatmul.mubr.msk.f32.vlgmr.msra.gmra.mrb[20].mxu0 %vm284_vm2, %v1733_v7 }
 0xd1f   :  { %4919 = vmatpush3.msra.mxu0 %v5817_v38  ;;  %4920 = vmatprep.mubr.msk.f32.mxu0 %vm5449_vm1, %v5448_v30 }
 0xd20   :  { %4928 = vmatprep.subr.mxu0 %v5448_v30 }
 0xde9   :  { %v1728_v44 = vpop.f32.mrb[16].mxu1 }
 0xdea   :  { %v4907_v45 = vpop.f32.mrb[17].mxu1 }
 0xded   :  { %v1655_v46 = vpop.f32.mrb[18].mxu0 }
 0xdee   :  { %v1729_v47 = vadd.f32 %v1728_v44, %v1655_v46  ;;  %v4902_v48 = vpop.f32.mrb[19].mxu0 }
 0xdef   :  { %v2343_v48 = vld [vmem:[#allocation10] sm:$0xff] }
 0xdf1   :  { %v1806_v49 = vpop.f32.mrb[20].mxu0 }
 0xdf2   :  { %v1810_v50 = vmul.f32 0.35355338, %v1806_v49  ;;  %v4912_v39 = vpop.f32.mrb[21].mxu0  ;;  %v2344_v49 = vld [vmem:[#allocation10 + $0x8] sm:$0xff] }
 0xdf3   :  { %v2251_v39 = vld [vmem:[%s6255_s8] sm:$0xff] }
 0xdf4   :  { %v1811_v51 = vsel %vm1252_vm4, -1e+09, %v1810_v50  ;;  %v5126_v50 = vpack.c.bf16 %v2344_v49, %v2343_v48  ;;  %v6037_v48 = vld [vmem:[#allocation11 + $0x8] sm:$0xff] }
 0xdf5   :  { %v1812_v52 = vsel %vm284_vm2, %v1811_v51, -inf }
 0xdf6   :  { %1813 = vmax.xlane.f32.xlu0 %v1812_v52  ;;  %v2345_v52 = vld [vmem:[#allocation10 + $0x10] sm:$0xff] }
 0xe0c   :  { %1823 = vrot.lane.b32.xlu0 %v5718_v33, %s5459_s22 }
 0xe10   :  { %1973 = vrot.lane.b32.xlu0 %v5718_v33, %s5458_s21 }
 0xe83   :  { %v1814_v38 = vpop.xlane.xlu0 %1813 }
 0xe84   :  { %v1815_v35 = vsub.f32 %v1811_v51, %v1814_v38  ;;  %v2252_v51 = vld [vmem:[%s6255_s8 + $0x8] sm:$0xff] }
 0xe85   :  { %v5118_v38 = vpack.c.bf16 %v2252_v51, %v2251_v39 }
 0xe86   :  { %v1816_v53 = vmul.f32 1.442695, %v1815_v35  ;;  %v2346_v35 = vld [vmem:[#allocation10 + $0x18] sm:$0xff] }
 0xe87   :  { %v1824_v54 = vpop.permute.xlu0 %1823 }
 0xe88   :  { %5209 = vpow2.f32 %v1816_v53  ;;  %4914 = vmatpush3.msra.mxu1 %v1824_v54  ;;  %v157_v53 = vld [vmem:[#allocation5] sm:$0xff] }
 0xe89   :  { %4923 = vmatprep.subr.mxu1 %v5448_v30  ;;  %v2253_v54 = vld [vmem:[%s6255_s8 + $0x10] sm:$0xff] }
 0xe8b   :  { %v1974_v63 = vpop.permute.xlu0 %1973 }
 0xe92   :  { %v5210_v55 = vpop.eup %5209 }
 0xe93   :  { %v1818_v56 = vsel %vm284_vm2, %v5210_v55, 0.0 }
 0xe94   :  { %1819 = vadd.xlane.f32.xlu1 %v1818_v56  ;;  %v2254_v56 = vld [vmem:[%s6255_s8 + $0x18] sm:$0xff] }
 0xea5   :  { %1975 = vrot.lane.b32.xlu1 %v5718_v33, %s5457_s20 }
 0xf21   :  { %v1820_v57 = vpop.xlane.xlu1 %1819 }
 0xf22   :  { %5211 = vrcp.f32 %v1820_v57  ;;  %v5122_v57 = vpack.c.bf16 %v2254_v56, %v2253_v54 }
 0xf25   :  { %v1976_v62 = vpop.permute.xlu1 %1975 }
 0xf2c   :  { %v5212_v58 = vpop.eup %5211 }
 0xf2d   :  { %v1822_v59 = vmul.f32 %v5212_v58, %v5210_v55  ;;  %v5130_v55 = vpack.c.bf16 %v2346_v35, %v2345_v52  ;;  %v158_v58 = vld [vmem:[#allocation5 + $0x8] sm:$0xff] }
 0xf2f   :  { %4916 = vmatmul.mubr.msk.f32.vlgmr.msra.gmra.mrb[18].mxu1 %vm284_vm2, %v1822_v59 }
 0xf30   :  { %4924 = vmatpush3.xpose.msk.msra.mxu1 %vm284_vm2, %v1976_v62  ;;  %4925 = vmatprep.mubr.msk.f32.mxu1 %vm5449_vm1, %v5448_v30 }
 0xf31   :  { %4933 = vmatprep.subr.mxu1 %v5448_v30 }
 0xf33   :  { %4926 = vmatmul.mubr.msk.f32.vlgmr.msra.gmra.mrb[20].mxu1 %vm284_vm2, %v1974_v63 }
 0xf34   :  { %4934 = vmatpush3.msra.mxu1 %v5855_v60  ;;  %4935 = vmatprep.mubr.msk.f32.mxu1 %vm5449_vm1, %v5448_v30 }
 0xf35   :  { %5127 = vmatprep.subr.bf16.mxu1 %v5126_v50 }
0x1002   :  { %v1895_v61 = vpop.f32.mrb[18].mxu1 }
0x1003   :  { %v4917_v4 = vpop.f32.mrb[19].mxu1  ;;  %4921 = vmatmul.mubr.msk.f32.vlgmr.msra.gmra.mrb[22].mxu0 %vm284_vm2, %v1895_v61 }
0x1004   :  { %4930 = vmatprep.mubr.msk.f32.mxu0 %vm5449_vm1, %v5448_v30  ;;  %v4635_v4 = vld [vmem:[%s6258_s11] ss:$0 sm:$0xff] }
0x1006   :  { %v2047_v6 = vpop.f32.mrb[20].mxu1 }
0x1007   :  { %v2051_v8 = vmul.f32 0.35355338, %v2047_v6  ;;  %v4927_v9 = vpop.f32.mrb[21].mxu1 }
0x1009   :  { %v2052_v60 = vsel %vm1252_vm4, -1e+09, %v2051_v8 }
0x100a   :  { %v2053_v11 = vsel %vm284_vm2, %v2052_v60, -inf }
0x100b   :  { %2054 = vmax.xlane.f32.xlu1 %v2053_v11 }
0x100f   :  { %2226 = vadd.xlane.f32.xlu1 %v2225_v12 }
0x1098   :  { %v2055_v13 = vpop.xlane.xlu1 %2054 }
0x1099   :  { %v2056_v14 = vsub.f32 %v2052_v60, %v2055_v13  ;;  %v4632_v60 = vld [vmem:[%s6256_s9] ss:$0 sm:$0xff] }
0x109b   :  { %v2057_v15 = vmul.f32 1.442695, %v2056_v14 }
0x109c   :  { %v2227_v25 = vpop.xlane.xlu1 %2226 }
0x109d   :  { %5213 = vpow2.f32 %v2057_v15  ;;  %v2231_v26 = vmul.f32 0.03125, %v2227_v25 }
0x109f   :  { %v2233_v29 = vsub.f32 %v5936_v10, %v2231_v26 }
0x10a1   :  { %v2235_v36 = vmul.f32 %v2233_v29, %v2233_v29 }
0x10a3   :  { %v2237_v37 = vsel %vm159_vm0, %v2235_v36, 0.0 }
0x10a7   :  { %v5214_v16 = vpop.eup %5213 }
0x10a8   :  { %v2059_v17 = vsel %vm284_vm2, %v5214_v16, 0.0 }
0x10a9   :  { %2060 = vadd.xlane.f32.xlu0 %v2059_v17  ;;  %v6007_v17 = vld [vmem:[#allocation8] sm:$0xff] }
0x10aa   :  { %vm2436_vm5 = vcmp.eq.f32.partialorder %v6007_v17, 0.0 }
0x10bf   :  { %2064 = vrot.lane.b32.xlu0 %v5718_v33, %s5460_s2 }
0x10d6   :  { %v1968_v0 = vpop.f32.mrb[22].mxu0 }
0x10d7   :  { %v1972_v2 = vadd.f32 %v1968_v0, %v1729_v47  ;;  %v4922_v18 = vpop.f32.mrb[23].mxu0 }
0x1136   :  { %v2061_v19 = vpop.xlane.xlu0 %2060 }
0x1137   :  { %5215 = vrcp.f32 %v2061_v19 }
0x113a   :  { %v2065_v20 = vpop.permute.xlu0 %2064 }
0x113b   :  { %4929 = vmatpush3.msra.mxu0 %v2065_v20 }
0x113c   :  { %5119 = vmatprep.subr.bf16.mxu0 %v5118_v38 }
0x1141   :  { %v5216_v21 = vpop.eup %5215 }
0x1142   :  { %v2063_v22 = vmul.f32 %v5216_v21, %v5214_v16 }
0x1144   :  { %4931 = vmatmul.mubr.msk.f32.vlgmr.msra.gmra.mrb[24].mxu0 %vm284_vm2, %v2063_v22 }
0x1145   :  { %5121 = vmatpush3.bf16.msra.mxu0 %v5118_v38 }
0x1146   :  { %5123 = vmatprep.subr.bf16.mxu0 %v5122_v57 }
0x1149   :  { %5125 = vmatpush3.bf16.msra.mxu0 %v5122_v57 }
0x114a   :  { %4960 = vmatprep.subr.mxu0 %v5448_v30 }
0x1217   :  { %v2136_v23 = vpop.f32.mrb[24].mxu0 }
0x1218   :  { %v4932_v24 = vpop.f32.mrb[25].mxu0  ;;  %4936 = vmatmul.mubr.msk.f32.vlgmr.msra.gmra.mrb[22].mxu1 %vm284_vm2, %v2136_v23 }
0x1219   :  { %4957 = vmatprep.mubr.msk.f32.mxu1 %vm159_vm0, %v157_v53  ;;  %5129 = vmatpush3.bf16.msra.mxu1 %v5126_v50 }
0x121a   :  { %5131 = vmatprep.subr.bf16.mxu1 %v5130_v55 }
0x121d   :  { %5133 = vmatpush3.bf16.msra.mxu1 %v5130_v55 }
0x121e   :  { %4965 = vmatprep.subr.mxu1 %v5448_v30 }
0x1220   :  { %4958 = vmatmul.mubr.msk.f32.vlgmr.msra.gmra.mrb[24].mxu1 %vm159_vm0, %v158_v58 }
0x1221   :  { %4967 = vmatprep.mubr.msk.f32.mxu1 %vm5449_vm1, %v5448_v30 }
0x12eb   :  { %v2209_v27 = vpop.f32.mrb[22].mxu1 }
0x12ec   :  { %v2213_v28 = vadd.f32 %v2209_v27, %v1972_v2  ;;  %v4937_v33 = vpop.f32.mrb[23].mxu1 }
0x12ee   :  { %v2222_v31 = vadd.f32 %v4631_v3, %v2213_v28 }
0x12f0   :  { %v5948_v32 = vadd.f32 %v2222_v31, %v5685_v1 }
0x12f2   :  { %v2228_v34 = vsel %vm159_vm0, %v5948_v32, 0.0 }
0x12f3   :  { %2229 = vadd.xlane.f32.xlu1 %v2228_v34  ;;  %v4959_v5 = vpop.f32.mrb[24].mxu1 }
0x12f4   :  { %v5980_v6 = vadd.f32 %v4959_v5, %v4635_v4  ;;  %v2426_v8 = vpop.f32.mrb[25].mxu1 }
0x12f5   :  { %v5982_v9 = vadd.f32 %v4635_v4, %v2426_v8 }
0x12f7   :  { %2238 = vadd.xlane.f32.xlu1 %v2237_v37 }
0x1380   :  { %v2230_v40 = vpop.xlane.xlu1 %2229 }
0x1381   :  { %v2232_v41 = vmul.f32 0.03125, %v2230_v40 }
0x1383   :  { %v2234_v42 = vsub.f32 %v5948_v32, %v2232_v41 }
0x1384   :  { %v2239_v43 = vpop.xlane.xlu1 %2238 }
0x1385   :  { %v2243_v7 = vmul.f32 0.032258064, %v2239_v43  ;;  %v2236_v44 = vmul.f32 %v2234_v42, %v2234_v42 }
0x1387   :  { %v2245_v45 = vadd.f32 1e-06, %v2243_v7  ;;  %v2240_v46 = vsel %vm159_vm0, %v2236_v44, 0.0 }
0x1388   :  { %2241 = vadd.xlane.f32.xlu1 %v2240_v46 }
0x1389   :  { %5217 = vrsqrt.f32 %v2245_v45 }
0x1393   :  { %v5218_v1 = vpop.eup %5217 }
0x1394   :  { %v2249_v47 = vmul.f32 %v5218_v1, %v2233_v29 }
0x1396   :  { %4946 = vmatprep.mubr.msk.f32.mxu0 %vm159_vm0, %v2249_v47  ;;  %v6034_v47 = vld [vmem:[#allocation11] sm:$0xff] }
0x1399   :  { %2605 = vrot.lane.b32.xlu1 %v5982_v9, %s5452_s29 }
0x1415   :  { %v2242_v59 = vpop.xlane.xlu1 %2241 }
0x1416   :  { %v2244_v62 = vmul.f32 0.032258064, %v2242_v59 }
0x1418   :  { %v2246_v63 = vadd.f32 1e-06, %v2244_v62 }
0x1419   :  { %v2606_v15 = vpop.permute.xlu1 %2605 }
0x141a   :  { %5219 = vrsqrt.f32 %v2246_v63 }
0x1424   :  { %v5220_v61 = vpop.eup %5219 }
0x1425   :  { %v2250_v3 = vmul.f32 %v5220_v61, %v2234_v42 }
0x1427   :  { %4947 = vmatmul.mubr.msk.f32.vlgmr.msra.gmra.mrb[26].mxu0 %vm159_vm0, %v2250_v3 }
0x1428   :  { %4962 = vmatprep.mubr.msk.f32.mxu0 %vm5449_vm1, %v5448_v30  ;;  %4961 = vmatpush3.xpose.msk.msra.mxu0 %vm284_vm2, %v5982_v9 }
0x1429   :  { %4970 = vmatprep.subr.mxu0 %v5448_v30 }
0x14fa   :  { %v4948_v11 = vpop.f32.mrb[26].mxu0 }
0x14fb   :  { %v5992_v12 = vadd.f32 %v4948_v11, %v4632_v60  ;;  %v2334_v13 = vpop.f32.mrb[27].mxu0 }
0x14fc   :  { %v5994_v14 = vadd.f32 %v4632_v60, %v2334_v13 }
0x14fe   :  { %2603 = vrot.lane.b32.xlu0 %v5994_v14, %s5452_s29  ;;  %4963 = vmatmul.mubr.msk.f32.vlgmr.msra.gmra.mrb[28].mxu0 %vm284_vm2, %v5994_v14 }
0x14ff   :  { %4971 = vmatpush3.xpose.msk.msra.mxu0 %vm284_vm2, %v2606_v15  ;;  %4972 = vmatprep.mubr.msk.f32.mxu0 %vm5449_vm1, %v5448_v30 }
0x1500   :  { %4980 = vmatprep.subr.mxu0 %v5448_v30 }
0x1570   :  { %v2604_v16 = vpop.permute.xlu0 %2603 }
0x1571   :  { %4973 = vmatmul.mubr.msk.f32.vlgmr.msra.gmra.mrb[30].mxu0 %vm284_vm2, %v2604_v16 }
0x1572   :  { %4982 = vmatprep.mubr.msk.f32.mxu0 %vm5449_vm1, %v5448_v30  ;;  %4981 = vmatpush3.msra.mxu0 %v6037_v48 }
0x1573   :  { %4990 = vmatprep.subr.mxu0 %v5448_v30 }
0x15d1   :  { %v2509_v0 = vpop.f32.mrb[28].mxu0 }
0x15d2   :  { %v2513_v2 = vmul.f32 0.35355338, %v2509_v0  ;;  %v4964_v18 = vpop.f32.mrb[29].mxu0  ;;  %v6072_v0 = vld [vmem:[#allocation11 + $0x10] sm:$0xff] }
0x15d4   :  { %v2514_v19 = vsel %vm2436_vm5, -1e+09, %v2513_v2 }
0x15d5   :  { %v2515_v20 = vsel %vm284_vm2, %v2514_v19, -inf }
0x15d6   :  { %2516 = vmax.xlane.f32.xlu0 %v2515_v20 }
0x1644   :  { %v2677_v21 = vpop.f32.mrb[30].mxu0 }
0x1645   :  { %v2681_v22 = vmul.f32 0.35355338, %v2677_v21  ;;  %v4974_v23 = vpop.f32.mrb[31].mxu0 }
0x1647   :  { %v2682_v24 = vsel %vm2436_vm5, -1e+09, %v2681_v22 }
0x1648   :  { %v2683_v25 = vsel %vm284_vm2, %v2682_v24, -inf }
0x1649   :  { %2684 = vmax.xlane.f32.xlu1 %v2683_v25 }
0x165a   :  { %2694 = vrot.lane.b32.xlu1 %v5982_v9, %s5450_s18 }
0x165e   :  { %2918 = vrot.lane.b32.xlu1 %v5994_v14, %s5455_s30 }
0x1663   :  { %v2517_v26 = vpop.xlane.xlu0 %2516 }
0x1664   :  { %v2518_v27 = vsub.f32 %v2514_v19, %v2517_v26 }
0x1666   :  { %v2519_v28 = vmul.f32 1.442695, %v2518_v27 }
0x1668   :  { %5221 = vpow2.f32 %v2519_v28 }
0x1672   :  { %v5222_v33 = vpop.eup %5221 }
0x1673   :  { %v2521_v29 = vsel %vm284_vm2, %v5222_v33, 0.0 }
0x1674   :  { %2522 = vadd.xlane.f32.xlu0 %v2521_v29 }
0x16d6   :  { %v2685_v31 = vpop.xlane.xlu1 %2684 }
0x16d7   :  { %v2686_v34 = vsub.f32 %v2682_v24, %v2685_v31 }
0x16d9   :  { %v2687_v36 = vmul.f32 1.442695, %v2686_v34 }
0x16da   :  { %v2695_v45 = vpop.permute.xlu1 %2694 }
0x16db   :  { %5223 = vpow2.f32 %v2687_v36 }
0x16de   :  { %v2919_v38 = vpop.permute.xlu1 %2918 }
0x16e5   :  { %v5224_v37 = vpop.eup %5223 }
0x16e6   :  { %v2689_v40 = vsel %vm284_vm2, %v5224_v37, 0.0 }
0x16e7   :  { %2690 = vadd.xlane.f32.xlu0 %v2689_v40 }
0x16fd   :  { %2526 = vrot.lane.b32.xlu0 %v5982_v9, %s5451_s12 }
0x1701   :  { %2920 = vrot.lane.b32.xlu0 %v5982_v9, %s5455_s30  ;;  %v2523_v41 = vpop.xlane.xlu0 %2522 }
0x1702   :  { %5225 = vrcp.f32 %v2523_v41  ;;  %v6109_v41 = vld [vmem:[#allocation11 + $0x18] sm:$0xff] }
0x170c   :  { %v5226_v43 = vpop.eup %5225 }
0x170d   :  { %v2525_v7 = vmul.f32 %v5226_v43, %v5222_v33 }
0x1774   :  { %v2691_v42 = vpop.xlane.xlu0 %2690 }
0x1775   :  { %5227 = vrcp.f32 %v2691_v42 }
0x1778   :  { %v2527_v44 = vpop.permute.xlu0 %2526 }
0x1779   :  { %4966 = vmatpush3.msra.mxu1 %v2527_v44 }
0x177a   :  { %4968 = vmatmul.mubr.msk.f32.vlgmr.msra.gmra.mrb[26].mxu1 %vm284_vm2, %v2525_v7  ;;  %4975 = vmatprep.subr.mxu1 %v5448_v30  ;;  %v6114_v7 = vld [vmem:[#allocation8 + $0x8] sm:$0xff] }
0x177b   :  { %4976 = vmatpush3.msra.mxu1 %v2695_v45  ;;  %4977 = vmatprep.mubr.msk.f32.mxu1 %vm5449_vm1, %v5448_v30  ;;  %vm3406_vm6 = vcmp.eq.f32.partialorder %v6114_v7, 0.0 }
0x177c   :  { %4985 = vmatprep.subr.mxu1 %v5448_v30  ;;  %v2921_v51 = vpop.permute.xlu0 %2920 }
0x177f   :  { %v5228_v46 = vpop.eup %5227 }
0x1780   :  { %v2693_v1 = vmul.f32 %v5228_v46, %v5224_v37 }
0x1782   :  { %4978 = vmatmul.mubr.msk.f32.vlgmr.msra.gmra.mrb[28].mxu1 %vm284_vm2, %v2693_v1 }
0x1783   :  { %4987 = vmatprep.mubr.msk.f32.mxu1 %vm5449_vm1, %v5448_v30  ;;  %4986 = vmatpush3.msra.mxu1 %v6034_v47 }
0x1784   :  { %4995 = vmatprep.subr.mxu1 %v5448_v30 }
0x184d   :  { %v2598_v49 = vpop.f32.mrb[26].mxu1 }
0x184e   :  { %v4969_v50 = vpop.f32.mrb[27].mxu1  ;;  %4988 = vmatmul.mubr.msk.f32.vlgmr.msra.gmra.mrb[30].mxu1 %vm284_vm2, %v2598_v49 }
0x184f   :  { %4997 = vmatprep.mubr.msk.f32.mxu1 %vm5449_vm1, %v5448_v30 }
0x1855   :  { %v2766_v39 = vpop.f32.mrb[28].mxu1 }
0x1856   :  { %v4979_v52 = vpop.f32.mrb[29].mxu1  ;;  %4983 = vmatmul.mubr.msk.f32.vlgmr.msra.gmra.mrb[32].mxu0 %vm284_vm2, %v2766_v39 }
0x1857   :  { %4991 = vmatpush3.xpose.msk.msra.mxu0 %vm284_vm2, %v2921_v51  ;;  %4992 = vmatprep.mubr.msk.f32.mxu0 %vm5449_vm1, %v5448_v30 }
0x1858   :  { %5000 = vmatprep.subr.mxu0 %v5448_v30 }
0x185a   :  { %4993 = vmatmul.mubr.msk.f32.vlgmr.msra.gmra.mrb[34].mxu0 %vm284_vm2, %v2919_v38 }
0x185b   :  { %5002 = vmatprep.mubr.msk.f32.mxu0 %vm5449_vm1, %v5448_v30  ;;  %5001 = vmatpush3.msra.mxu0 %v6072_v0 }
0x185c   :  { %5010 = vmatprep.subr.mxu0 %v5448_v30 }
0x1921   :  { %v2914_v35 = vpop.f32.mrb[30].mxu1 }
0x1922   :  { %v4989_v53 = vpop.f32.mrb[31].mxu1 }
0x1929   :  { %v2841_v54 = vpop.f32.mrb[32].mxu0 }
0x192a   :  { %v2915_v55 = vadd.f32 %v2914_v35, %v2841_v54  ;;  %v4984_v56 = vpop.f32.mrb[33].mxu0 }
0x192d   :  { %v2992_v57 = vpop.f32.mrb[34].mxu0 }
0x192e   :  { %v2996_v58 = vmul.f32 0.35355338, %v2992_v57  ;;  %v4994_v59 = vpop.f32.mrb[35].mxu0 }
0x1930   :  { %v2997_v62 = vsel %vm2436_vm5, -1e+09, %v2996_v58 }
0x1931   :  { %v2998_v63 = vsel %vm284_vm2, %v2997_v62, -inf }
0x1932   :  { %2999 = vmax.xlane.f32.xlu0 %v2998_v63 }
0x1948   :  { %3009 = vrot.lane.b32.xlu0 %v5982_v9, %s5454_s24 }
0x194c   :  { %3161 = vrot.lane.b32.xlu0 %v5994_v14, %s5458_s21 }
0x19bf   :  { %v3000_v61 = vpop.xlane.xlu0 %2999 }
0x19c0   :  { %v3001_v3 = vsub.f32 %v2997_v62, %v3000_v61 }
0x19c2   :  { %v3002_v4 = vmul.f32 1.442695, %v3001_v3 }
0x19c3   :  { %v3010_v5 = vpop.permute.xlu0 %3009 }
0x19c4   :  { %5229 = vpow2.f32 %v3002_v4  ;;  %4996 = vmatpush3.msra.mxu1 %v3010_v5 }
0x19c5   :  { %5005 = vmatprep.subr.mxu1 %v5448_v30 }
0x19c7   :  { %v3162_v16 = vpop.permute.xlu0 %3161 }
0x19ce   :  { %v5230_v8 = vpop.eup %5229 }
0x19cf   :  { %v3004_v60 = vsel %vm284_vm2, %v5230_v8, 0.0 }
0x19d0   :  { %3005 = vadd.xlane.f32.xlu1 %v3004_v60 }
0x19e1   :  { %3163 = vrot.lane.b32.xlu1 %v5982_v9, %s5458_s21 }
0x1a5d   :  { %v3006_v11 = vpop.xlane.xlu1 %3005 }
0x1a5e   :  { %5231 = vrcp.f32 %v3006_v11 }
0x1a61   :  { %v3164_v14 = vpop.permute.xlu1 %3163 }
0x1a68   :  { %v5232_v13 = vpop.eup %5231 }
0x1a69   :  { %v3008_v15 = vmul.f32 %v5232_v13, %v5230_v8 }
0x1a6b   :  { %4998 = vmatmul.mubr.msk.f32.vlgmr.msra.gmra.mrb[32].mxu1 %vm284_vm2, %v3008_v15 }
0x1a6c   :  { %5006 = vmatpush3.xpose.msk.msra.mxu1 %vm284_vm2, %v3164_v14  ;;  %5007 = vmatprep.mubr.msk.f32.mxu1 %vm5449_vm1, %v5448_v30 }
0x1a6d   :  { %5015 = vmatprep.subr.mxu1 %v5448_v30 }
0x1a6f   :  { %5008 = vmatmul.mubr.msk.f32.vlgmr.msra.gmra.mrb[34].mxu1 %vm284_vm2, %v3162_v16 }
0x1a70   :  { %5017 = vmatprep.mubr.msk.f32.mxu1 %vm5449_vm1, %v5448_v30  ;;  %5016 = vmatpush3.msra.mxu1 %v6109_v41 }
0x1a71   :  { %5025 = vmatprep.subr.mxu1 %v5448_v30 }
0x1b3e   :  { %v3081_v2 = vpop.f32.mrb[32].mxu1 }
0x1b3f   :  { %v4999_v18 = vpop.f32.mrb[33].mxu1  ;;  %5003 = vmatmul.mubr.msk.f32.vlgmr.msra.gmra.mrb[36].mxu0 %vm284_vm2, %v3081_v2 }
0x1b40   :  { %5012 = vmatprep.mubr.msk.f32.mxu0 %vm5449_vm1, %v5448_v30 }
0x1b42   :  { %v3235_v19 = vpop.f32.mrb[34].mxu1 }
0x1b43   :  { %v3239_v20 = vmul.f32 0.35355338, %v3235_v19  ;;  %v5009_v21 = vpop.f32.mrb[35].mxu1 }
0x1b45   :  { %v3240_v22 = vsel %vm2436_vm5, -1e+09, %v3239_v20 }
0x1b46   :  { %v3241_v23 = vsel %vm284_vm2, %v3240_v22, -inf }
0x1b47   :  { %3242 = vmax.xlane.f32.xlu1 %v3241_v23 }
0x1b58   :  { %3574 = vrot.lane.b32.xlu1 %v5980_v6, %s5452_s29 }
0x1b5c   :  { %3572 = vrot.lane.b32.xlu1 %v5992_v12, %s5452_s29 }
0x1bd4   :  { %v3243_v24 = vpop.xlane.xlu1 %3242 }
0x1bd5   :  { %v3244_v25 = vsub.f32 %v3240_v22, %v3243_v24 }
0x1bd7   :  { %v3245_v26 = vmul.f32 1.442695, %v3244_v25 }
0x1bd8   :  { %v3575_v40 = vpop.permute.xlu1 %3574 }
0x1bd9   :  { %5233 = vpow2.f32 %v3245_v26 }
0x1be3   :  { %v5234_v27 = vpop.eup %5233 }
0x1be4   :  { %v3247_v28 = vsel %vm284_vm2, %v5234_v27, 0.0 }
0x1be5   :  { %3248 = vadd.xlane.f32.xlu0 %v3247_v28 }
0x1bfb   :  { %3252 = vrot.lane.b32.xlu0 %v5982_v9, %s5457_s20  ;;  %v3573_v9 = vpop.permute.xlu1 %3572 }
0x1c12   :  { %v3156_v17 = vpop.f32.mrb[36].mxu0 }
0x1c13   :  { %v6089_v33 = vadd.f32 %v3156_v17, %v2915_v55  ;;  %v5004_v29 = vpop.f32.mrb[37].mxu0 }
0x1c72   :  { %v3249_v31 = vpop.xlane.xlu0 %3248 }
0x1c73   :  { %5235 = vrcp.f32 %v3249_v31 }
0x1c76   :  { %v3253_v34 = vpop.permute.xlu0 %3252 }
0x1c77   :  { %5011 = vmatpush3.msra.mxu0 %v3253_v34 }
0x1c78   :  { %5020 = vmatprep.subr.mxu0 %v5448_v30 }
0x1c7d   :  { %v5236_v36 = vpop.eup %5235 }
0x1c7e   :  { %v3251_v37 = vmul.f32 %v5236_v36, %v5234_v27 }
0x1c80   :  { %5013 = vmatmul.mubr.msk.f32.vlgmr.msra.gmra.mrb[38].mxu0 %vm284_vm2, %v3251_v37 }
0x1c81   :  { %5021 = vmatpush3.xpose.msk.msra.mxu0 %vm284_vm2, %v5980_v6  ;;  %5022 = vmatprep.mubr.msk.f32.mxu0 %vm5449_vm1, %v5448_v30 }
0x1c82   :  { %5030 = vmatprep.subr.mxu0 %v5448_v30 }
0x1c84   :  { %5023 = vmatmul.mubr.msk.f32.vlgmr.msra.gmra.mrb[40].mxu0 %vm284_vm2, %v5992_v12 }
0x1c85   :  { %5031 = vmatpush3.xpose.msk.msra.mxu0 %vm284_vm2, %v3575_v40  ;;  %5032 = vmatprep.mubr.msk.f32.mxu0 %vm5449_vm1, %v5448_v30 }
0x1c86   :  { %5040 = vmatprep.subr.mxu0 %v5448_v30 }
0x1c88   :  { %5033 = vmatmul.mubr.msk.f32.vlgmr.msra.gmra.mrb[42].mxu0 %vm284_vm2, %v3573_v9 }
0x1c89   :  { %5041 = vmatpush3.msra.mxu0 %v6037_v48  ;;  %5042 = vmatprep.mubr.msk.f32.mxu0 %vm5449_vm1, %v5448_v30 }
0x1c8a   :  { %5050 = vmatprep.subr.mxu0 %v5448_v30 }
0x1d53   :  { %v3324_v42 = vpop.f32.mrb[38].mxu0 }
0x1d54   :  { %v5014_v43 = vpop.f32.mrb[39].mxu0  ;;  %5018 = vmatmul.mubr.msk.f32.vlgmr.msra.gmra.mrb[36].mxu1 %vm284_vm2, %v3324_v42 }
0x1d55   :  { %5027 = vmatprep.mubr.msk.f32.mxu1 %vm5449_vm1, %v5448_v30 }
0x1d57   :  { %v3479_v44 = vpop.f32.mrb[40].mxu0 }
0x1d58   :  { %v3483_v45 = vmul.f32 0.35355338, %v3479_v44  ;;  %v5024_v46 = vpop.f32.mrb[41].mxu0 }
0x1d5a   :  { %v3484_v1 = vsel %vm3406_vm6, -1e+09, %v3483_v45 }
0x1d5b   :  { %v3646_v48 = vpop.f32.mrb[42].mxu0  ;;  %v3485_v49 = vsel %vm284_vm2, %v3484_v1, -inf }
0x1d5c   :  { %v3650_v50 = vmul.f32 0.35355338, %v3646_v48  ;;  %3486 = vmax.xlane.f32.xlu0 %v3485_v49  ;;  %v5034_v39 = vpop.f32.mrb[43].mxu0 }
0x1d5e   :  { %v3651_v51 = vsel %vm3406_vm6, -1e+09, %v3650_v50 }
0x1d5f   :  { %v3652_v52 = vsel %vm284_vm2, %v3651_v51, -inf }
0x1d60   :  { %3653 = vmax.xlane.f32.xlu1 %v3652_v52 }
0x1d71   :  { %3663 = vrot.lane.b32.xlu1 %v5980_v6, %s5450_s18 }
0x1d75   :  { %3887 = vrot.lane.b32.xlu1 %v5980_v6, %s5455_s30 }
0x1d79   :  { %3885 = vrot.lane.b32.xlu1 %v5992_v12, %s5455_s30 }
0x1de9   :  { %v3487_v38 = vpop.xlane.xlu0 %3486 }
0x1dea   :  { %v3488_v35 = vsub.f32 %v3484_v1, %v3487_v38 }
0x1dec   :  { %v3489_v53 = vmul.f32 1.442695, %v3488_v35 }
0x1ded   :  { %v3654_v54 = vpop.xlane.xlu1 %3653 }
0x1dee   :  { %5237 = vpow2.f32 %v3489_v53  ;;  %v3655_v55 = vsub.f32 %v3651_v51, %v3654_v54 }
0x1df0   :  { %v3656_v56 = vmul.f32 1.442695, %v3655_v55  ;;  %v4670_v55 = vld [vmem:[%s6260_s13] ss:$0 sm:$0xff] }
0x1df1   :  { %v3664_v13 = vpop.permute.xlu1 %3663 }
0x1df2   :  { %5239 = vpow2.f32 %v3656_v56 }
0x1df5   :  { %v3888_v18 = vpop.permute.xlu1 %3887 }
0x1df8   :  { %v5238_v57 = vpop.eup %5237 }
0x1df9   :  { %v3491_v58 = vsel %vm284_vm2, %v5238_v57, 0.0 }
0x1dfa   :  { %3492 = vadd.xlane.f32.xlu0 %v3491_v58 }
0x1dfc   :  { %v5240_v59 = vpop.eup %5239 }
0x1dfd   :  { %v3658_v62 = vsel %vm284_vm2, %v5240_v59, 0.0 }
0x1dfe   :  { %3659 = vadd.xlane.f32.xlu0 %v3658_v62  ;;  %v4379_v62 = vld [vmem:[#allocation13 + $0x8] sm:$0xff] }
0x1e14   :  { %3496 = vrot.lane.b32.xlu0 %v5980_v6, %s5451_s12 }
0x1e27   :  { %v3399_v63 = vpop.f32.mrb[36].mxu1 }
0x1e28   :  { %v6136_v61 = vadd.f32 %v3399_v63, %v6089_v33  ;;  %v5019_v3 = vpop.f32.mrb[37].mxu1 }
0x1e2a   :  { %v4374_v56 = vadd.f32 %v4670_v55, %v6136_v61 }
0x1e87   :  { %v3493_v4 = vpop.xlane.xlu0 %3492 }
0x1e88   :  { %5241 = vrcp.f32 %v3493_v4 }
0x1e8b   :  { %v3660_v5 = vpop.xlane.xlu0 %3659 }
0x1e8c   :  { %5243 = vrcp.f32 %v3660_v5  ;;  %v4380_v5 = vld [vmem:[#allocation13 + $0x10] sm:$0xff] }
0x1e8f   :  { %v3497_v8 = vpop.permute.xlu0 %3496 }
0x1e90   :  { %5026 = vmatpush3.msra.mxu1 %v3497_v8  ;;  %v4381_v8 = vld [vmem:[#allocation13 + $0x18] sm:$0xff] }
0x1e91   :  { %5035 = vmatprep.subr.mxu1 %v5448_v30  ;;  %v5138_v61 = vpack.c.bf16 %v4381_v8, %v4380_v5 }
0x1e92   :  { %v5242_v60 = vpop.eup %5241 }
0x1e93   :  { %v3495_v11 = vmul.f32 %v5242_v60, %v5238_v57  ;;  %v4473_v60 = vld [vmem:[%s6263_s16 + $0x8] sm:$0xff] }
0x1e95   :  { %5028 = vmatmul.mubr.msk.f32.vlgmr.msra.gmra.mrb[38].mxu1 %vm284_vm2, %v3495_v11  ;;  %v4474_v11 = vld [vmem:[%s6263_s16 + $0x10] sm:$0xff] }
0x1e96   :  { %v5244_v15 = vpop.eup %5243  ;;  %5036 = vmatpush3.msra.mxu1 %v3664_v13  ;;  %5037 = vmatprep.mubr.msk.f32.mxu1 %vm5449_vm1, %v5448_v30 }
0x1e97   :  { %v3662_v14 = vmul.f32 %v5244_v15, %v5240_v59  ;;  %5045 = vmatprep.subr.mxu1 %v5448_v30  ;;  %v4376_v59 = vadd.f32 %v4374_v56, %v5936_v10  ;;  %v4472_v10 = vld [vmem:[%s6263_s16] sm:$0xff]  ;;  %v4475_v15 = vld [vmem:[%s6263_s16 + $0x18] sm:$0xff] }
0x1e98   :  { %v5142_v13 = vpack.c.bf16 %v4473_v60, %v4472_v10 }
0x1e99   :  { %5038 = vmatmul.mubr.msk.f32.vlgmr.msra.gmra.mrb[40].mxu1 %vm284_vm2, %v3662_v14  ;;  %v5146_v14 = vpack.c.bf16 %v4475_v15, %v4474_v11 }
0x1e9a   :  { %5046 = vmatpush3.msra.mxu1 %v6034_v47  ;;  %5047 = vmatprep.mubr.msk.f32.mxu1 %vm5449_vm1, %v5448_v30  ;;  %v3886_v47 = vpop.permute.xlu1 %3885 }
0x1e9b   :  { %5055 = vmatprep.subr.mxu1 %v5448_v30 }
0x1f68   :  { %v3568_v16 = vpop.f32.mrb[38].mxu1 }
0x1f69   :  { %v5029_v2 = vpop.f32.mrb[39].mxu1  ;;  %5048 = vmatmul.mubr.msk.f32.vlgmr.msra.gmra.mrb[42].mxu1 %vm284_vm2, %v3568_v16  ;;  %v4476_v16 = vld [vmem:[%s6263_s16 + $0x20] sm:$0xff] }
0x1f6a   :  { %5057 = vmatprep.mubr.msk.f32.mxu1 %vm5449_vm1, %v5448_v30  ;;  %v4477_v2 = vld [vmem:[%s6263_s16 + $0x28] sm:$0xff] }
0x1f6c   :  { %v3735_v19 = vpop.f32.mrb[40].mxu1 }
0x1f6d   :  { %v5039_v20 = vpop.f32.mrb[41].mxu1  ;;  %5043 = vmatmul.mubr.msk.f32.vlgmr.msra.gmra.mrb[44].mxu0 %vm284_vm2, %v3735_v19 }
0x1f6e   :  { %5051 = vmatpush3.xpose.msk.msra.mxu0 %vm284_vm2, %v3888_v18  ;;  %5052 = vmatprep.mubr.msk.f32.mxu0 %vm5449_vm1, %v5448_v30  ;;  %v5150_v18 = vpack.c.bf16 %v4477_v2, %v4476_v16 }
0x1f6f   :  { %5060 = vmatprep.subr.mxu0 %v5448_v30 }
0x1f71   :  { %5053 = vmatmul.mubr.msk.f32.vlgmr.msra.gmra.mrb[46].mxu0 %vm284_vm2, %v3886_v47 }
0x1f72   :  { %5061 = vmatpush3.msra.mxu0 %v6072_v0  ;;  %5062 = vmatprep.mubr.msk.f32.mxu0 %vm5449_vm1, %v5448_v30 }
0x1f73   :  { %5070 = vmatprep.subr.mxu0 %v5448_v30 }
0x203c   :  { %v3881_v21 = vpop.f32.mrb[42].mxu1 }
0x203d   :  { %v5049_v22 = vpop.f32.mrb[43].mxu1 }
0x2040   :  { %v3808_v23 = vpop.f32.mrb[44].mxu0 }
0x2041   :  { %v3882_v24 = vadd.f32 %v3881_v21, %v3808_v23  ;;  %v5044_v25 = vpop.f32.mrb[45].mxu0  ;;  %v4478_v23 = vld [vmem:[%s6263_s16 + $0x30] sm:$0xff] }
0x2044   :  { %v3959_v26 = vpop.f32.mrb[46].mxu0 }
0x2045   :  { %v3963_v27 = vmul.f32 0.35355338, %v3959_v26  ;;  %v5054_v28 = vpop.f32.mrb[47].mxu0  ;;  %v4671_v26 = vld [vmem:[%s6262_s15] ss:$0 sm:$0xff] }
0x2047   :  { %v3964_v17 = vsel %vm3406_vm6, -1e+09, %v3963_v27 }
0x2048   :  { %v3965_v33 = vsel %vm284_vm2, %v3964_v17, -inf }
0x2049   :  { %3966 = vmax.xlane.f32.xlu0 %v3965_v33 }
0x205f   :  { %3976 = vrot.lane.b32.xlu0 %v5980_v6, %s5454_s24 }
0x2063   :  { %4126 = vrot.lane.b32.xlu0 %v5992_v12, %s5458_s21 }
0x20d6   :  { %v3967_v0 = vpop.xlane.xlu0 %3966 }
0x20d7   :  { %v3968_v29 = vsub.f32 %v3964_v17, %v3967_v0 }
0x20d9   :  { %v3969_v31 = vmul.f32 1.442695, %v3968_v29  ;;  %v4674_v29 = vld [vmem:[%s6264_s17] ss:$0 sm:$0xff] }
0x20da   :  { %v3977_v34 = vpop.permute.xlu0 %3976 }
0x20db   :  { %5245 = vpow2.f32 %v3969_v31  ;;  %5056 = vmatpush3.msra.mxu1 %v3977_v34 }
0x20dc   :  { %5065 = vmatprep.subr.mxu1 %v5448_v30 }
0x20de   :  { %v4127_v43 = vpop.permute.xlu0 %4126 }
0x20e5   :  { %v5246_v36 = vpop.eup %5245 }
0x20e6   :  { %v3971_v37 = vsel %vm284_vm2, %v5246_v36, 0.0 }
0x20e7   :  { %3972 = vadd.xlane.f32.xlu1 %v3971_v37 }
0x20f8   :  { %4128 = vrot.lane.b32.xlu1 %v5980_v6, %s5458_s21 }
0x2174   :  { %v3973_v40 = vpop.xlane.xlu1 %3972 }
0x2175   :  { %5247 = vrcp.f32 %v3973_v40 }
0x2178   :  { %v4129_v12 = vpop.permute.xlu1 %4128 }
0x217f   :  { %v5248_v9 = vpop.eup %5247 }
0x2180   :  { %v3975_v42 = vmul.f32 %v5248_v9, %v5246_v36 }
0x2182   :  { %5058 = vmatmul.mubr.msk.f32.vlgmr.msra.gmra.mrb[44].mxu1 %vm284_vm2, %v3975_v42 }
0x2183   :  { %5066 = vmatpush3.xpose.msk.msra.mxu1 %vm284_vm2, %v4129_v12  ;;  %5067 = vmatprep.mubr.msk.f32.mxu1 %vm5449_vm1, %v5448_v30 }
0x2184   :  { %5075 = vmatprep.subr.mxu1 %v5448_v30 }
0x2186   :  { %5068 = vmatmul.mubr.msk.f32.vlgmr.msra.gmra.mrb[46].mxu1 %vm284_vm2, %v4127_v43 }
0x2187   :  { %5076 = vmatpush3.msra.mxu1 %v6109_v41  ;;  %5077 = vmatprep.mubr.msk.f32.mxu1 %vm5449_vm1, %v5448_v30 }
0x2188   :  { %5143 = vmatprep.subr.bf16.mxu1 %v5142_v13 }
0x2255   :  { %v4048_v44 = vpop.f32.mrb[44].mxu1 }
0x2256   :  { %v5059_v45 = vpop.f32.mrb[45].mxu1  ;;  %5063 = vmatmul.mubr.msk.f32.vlgmr.msra.gmra.mrb[48].mxu0 %vm284_vm2, %v4048_v44 }
0x2257   :  { %5072 = vmatprep.mubr.msk.f32.mxu0 %vm5449_vm1, %v5448_v30 }
0x2259   :  { %v4200_v46 = vpop.f32.mrb[46].mxu1 }
0x225a   :  { %v4204_v1 = vmul.f32 0.35355338, %v4200_v46  ;;  %v5069_v48 = vpop.f32.mrb[47].mxu1 }
0x225c   :  { %v4205_v49 = vsel %vm3406_vm6, -1e+09, %v4204_v1 }
0x225d   :  { %v4206_v50 = vsel %vm284_vm2, %v4205_v49, -inf }
0x225e   :  { %4207 = vmax.xlane.f32.xlu1 %v4206_v50 }
0x22eb   :  { %v4208_v41 = vpop.xlane.xlu1 %4207 }
0x22ec   :  { %v4209_v39 = vsub.f32 %v4205_v49, %v4208_v41 }
0x22ee   :  { %v4210_v51 = vmul.f32 1.442695, %v4209_v39 }
0x22f0   :  { %5249 = vpow2.f32 %v4210_v51 }
0x22fa   :  { %v5250_v52 = vpop.eup %5249 }
0x22fb   :  { %v4212_v38 = vsel %vm284_vm2, %v5250_v52, 0.0 }
0x22fc   :  { %4213 = vadd.xlane.f32.xlu0 %v4212_v38 }
0x2312   :  { %4217 = vrot.lane.b32.xlu0 %v5980_v6, %s5457_s20  ;;  %v4378_v6 = vld [vmem:[#allocation13] sm:$0xff] }
0x2313   :  { %v5134_v63 = vpack.c.bf16 %v4379_v62, %v4378_v6 }
0x2329   :  { %v4121_v30 = vpop.f32.mrb[48].mxu0 }
0x232a   :  { %v4125_v35 = vadd.f32 %v4121_v30, %v3882_v24  ;;  %v5064_v53 = vpop.f32.mrb[49].mxu0  ;;  %v4479_v24 = vld [vmem:[%s6263_s16 + $0x38] sm:$0xff]  ;;  %s5461_s16 = smov [#allocation14]  }
0x232b   :  { %v5154_v25 = vpack.c.bf16 %v4479_v24, %v4478_v23  ;;  %s4578_s8 = sshll.u32 %s5461_s16, 4  ;;  %s4579_s8 = int_to_ptr.vmem [resolvable:$true] %s4578_s8 }
0x232c   :  { %s5407_s15 = scalar_lea.vmem %s4579_s8, 256  ;;  %p5412_p1 = scmp.lt.s32.totalorder %s4579_s8, %s4579_s8 }
0x232d   :  { %p5408_p0 = scmp.ne.s32.totalorder %s4579_s8, %s5407_s15  ;;  %p5413_p2 = scmp.lt.s32.totalorder %s5407_s15, %s5407_s15 }
0x232f   :  { %p5414_p3 = por %p5413_p2, %p5412_p1 }
0x2331   :  { %p5415_p4 = pnand %p5414_p3, %p5408_p0 }
0x2389   :  { %v4214_v54 = vpop.xlane.xlu0 %4213 }
0x238a   :  { %5251 = vrcp.f32 %v4214_v54 }
0x238d   :  { %v4218_v7 = vpop.permute.xlu0 %4217 }
0x238e   :  { %5071 = vmatpush3.msra.mxu0 %v4218_v7 }
0x238f   :  { %5135 = vmatprep.subr.bf16.mxu0 %v5134_v63 }
0x2394   :  { %v5252_v57 = vpop.eup %5251 }
0x2395   :  { %v4216_v58 = vmul.f32 %v5252_v57, %v5250_v52 }
0x2397   :  { %5073 = vmatmul.mubr.msk.f32.vlgmr.msra.gmra.mrb[50].mxu0 %vm284_vm2, %v4216_v58 }
0x2398   :  { %5088 = vmatprep.mubr.msk.f32.mxu0 %vm159_vm0, %v4376_v59  ;;  %5137 = vmatpush3.bf16.msra.mxu0 %v5134_v63 }
0x2399   :  { %5139 = vmatprep.subr.bf16.mxu0 %v5138_v61 }
0x239c   :  { %5141 = vmatpush3.bf16.msra.mxu0 %v5138_v61 }
0x246a   :  { %v4289_v3 = vpop.f32.mrb[50].mxu0 }
0x246b   :  { %v5074_v4 = vpop.f32.mrb[51].mxu0  ;;  %5078 = vmatmul.mubr.msk.f32.vlgmr.msra.gmra.mrb[48].mxu1 %vm284_vm2, %v4289_v3 }
0x246c   :  { %5145 = vmatpush3.bf16.msra.mxu1 %v5142_v13 }
0x246d   :  { %5147 = vmatprep.subr.bf16.mxu1 %v5146_v14 }
0x2470   :  { %5149 = vmatpush3.bf16.msra.mxu1 %v5146_v14 }
0x2471   :  { %5151 = vmatprep.subr.bf16.mxu1 %v5150_v18 }
0x2474   :  { %5153 = vmatpush3.bf16.msra.mxu1 %v5150_v18 }
0x2475   :  { %5155 = vmatprep.subr.bf16.mxu1 %v5154_v25 }
0x2478   :  { %5157 = vmatpush3.bf16.msra.mxu1 %v5154_v25 }
0x253e   :  { %v4362_v19 = vpop.f32.mrb[48].mxu1 }
0x253f   :  { %v4366_v20 = vadd.f32 %v4362_v19, %v4125_v35  ;;  %v5079_v47 = vpop.f32.mrb[49].mxu1 }
0x2541   :  { %v4375_v21 = vadd.f32 %v4670_v55, %v4366_v20 }
0x2543   :  { %v4377_v22 = vadd.f32 %v4375_v21, %v5948_v32 }
0x2545   :  { %5089 = vmatmul.mubr.msk.f32.vlgmr.msra.gmra.mrb[52].mxu0 %vm159_vm0, %v4377_v22 }
0x2618   :  { %v5090_v27 = vpop.f32.mrb[52].mxu0 }
0x2619   :  { %v4467_v28 = vadd.f32 %v5090_v27, %v4671_v26  ;;  %v4461_v32 = vpop.f32.mrb[53].mxu0 }
0x261a   :  { %v4462_v17 = vadd.f32 %v4671_v26, %v4461_v32 }
0x261b   :  { %v4471_v0 = vmax.f32 %v4467_v28, 0.0 }
0x261c   :  { %v4470_v33 = vmax.f32 %v4462_v17, 0.0 }
0x261e   :  { %5107 = vmatprep.mubr.msk.f32.mxu1 %vm4487_vm7, %v4470_v33 }
0x261f   :  { %5108 = vmatmul.mubr.msk.f32.vlgmr.msra.gmra.mrb[50].mxu1 %vm4487_vm7, %v4471_v0 }
0x26f2   :  { %v5109_v31 = vpop.f32.mrb[50].mxu1 }
0x26f3   :  { %v4566_v34 = vadd.f32 %v5109_v31, %v4674_v29  ;;  %v4560_v36 = vpop.f32.mrb[51].mxu1 }
0x26f4   :  { %v4561_v37 = vadd.f32 %v4674_v29, %v4560_v36 }
0x26f5   :  { %v4570_v40 = vadd.f32 %v4566_v34, %v4377_v22 }
0x26f6   :  { %v4569_v9 = vadd.f32 %v4561_v37, %v4376_v59 }
0x26f7   :  { %4572 = vst.msk [vmem:[#allocation14 + $0x8] sm:$0xff] %vm159_vm0, %v4570_v40 }
0x26f8   :  { %4571 = vst.msk [vmem:[#allocation14] sm:$0xff] %vm159_vm0, %v4569_v9 }
0x26f9   :  { %5418 = shalt.err (!%p5415_p4)
}
0x26fa   :  { %s6277_s0 = sld [smem:[#allocation23_spill]] }
0x2700   :  { %s5419_s2 = scalar_lea.hbm %s6277_s0, 256 }
0x2701   :  { %p5420_p5 = scmp.ne.s32.totalorder %s6277_s0, %s5419_s2  ;;  %p5423_p6 = scmp.lt.u32.totalorder %s5419_s2, %s6277_s0 }
0x2703   :  { %p5425_p7 = pnand %p5423_p6, %p5420_p5 }
0x2705   :  { %5428 = shalt.err (!%p5425_p7)
}
0x2706   :  { %4584 = dma.vmem_to_hbm [thread:$0]  %s4579_s8, 256, %s6277_s0, [#allocation4], %s5441_s25, %s5441_s25, %s5442_s26  }
0x2707   :  { %5437 = dma.done.wait [#allocation4], 256  }
0x2708   :  { %5438 = vsyncadd [#allocation4], 4294967040 }
0x2709   :  { %4588 = vsyncpa [#allocation3], 1 }
0x270a   :  { %4589 = vsyncpa [#allocation6], 1 }
0x270b   :  { %4590 = vsyncpa [#allocation9], 1 }
0x270c   :  { %4591 = vsyncpa [#allocation12], 1 }
0x270d   :  { %4592 = vsyncpa [#allocation4], 1 }

</bundles_post_ra>
